<compile_context>
chip_gen: v5e
topology: v5e:2x2
jax: 0.10.0
libtpu: 0.0.40
codegen_flags: <defaults>
</compile_context>

<pallas_src>
import jax
import jax.numpy as jnp
from jax.experimental import pallas as pl
from jax.experimental.pallas import tpu as pltpu

Z_SIZE = 32
H1 = 256
H2 = 512
OUT = 1000


def _round_up(x, m):
    return ((x + m - 1) // m) * m


def _choose_tile_b(B, *, max_tile=512):
    """Pick the batch tile.

    * always a multiple of 16 sublanes (bf16 packs 16 rows per vreg),
    * small B: a single grid step with minimal padding (<= 15 rows),
    * large B: tiles up to `max_tile` (1024 for very large B) to amortize the
      ~0.35 us per-grid-step overhead, but keep >= 2 steps (>= 4 when the tile
      stays >= 256 rows) so dimension_semantics=("parallel",) can shard the
      batch across v7x's two TensorCores.
    """
    B16 = _round_up(max(B, 16), 16)
    if B16 >= 8 * 1024:
        max_tile = 1024
    if B16 <= max_tile:
        return B16
    steps = max(2, pl.cdiv(B16, max_tile))
    if steps < 4 and pl.cdiv(B16, 4) >= 256:
        steps = 4
    return _round_up(pl.cdiv(B16, steps), 16)


def _mlp_kernel(z_ref, w1_ref, b1_ref, w2_ref, b2_ref, w3_ref, b3_ref, out_ref):
    # Layer 1: (TB, 32) @ (32, 256) + b1 -> ReLU          (bf16 in, f32 acc)
    h1 = jnp.dot(z_ref[...], w1_ref[...], preferred_element_type=jnp.float32)
    h1 = jnp.maximum(h1 + b1_ref[...], 0.0).astype(w2_ref.dtype)
    # Layer 2: (TB, 256) @ (256, 512) + b2 -> ReLU
    h2 = jnp.dot(h1, w2_ref[...], preferred_element_type=jnp.float32)
    h2 = jnp.maximum(h2 + b2_ref[...], 0.0).astype(w3_ref.dtype)
    # Layer 3: (TB, 512) @ (512, 1000) + b3   (no activation; masked tail vst)
    h3 = jnp.dot(h2, w3_ref[...], preferred_element_type=jnp.float32)
    out_ref[...] = (h3 + b3_ref[...]).astype(out_ref.dtype)


def generator_apply(z, params, *, out_dtype=jnp.float32, max_tile=512):
    """z: (B, 32) float32 -> (B, 1000, 1) in `out_dtype` (default f32)."""
    w1, b1, w2, b2, w3, b3 = params      # w*: bf16 (in, out); b*: f32 (1, out)
    B = z.shape[0]

    tile_b = _choose_tile_b(B, max_tile=max_tile)
    B_pad = _round_up(B, tile_b)
    if B_pad != B:
        z = jnp.pad(z, ((0, B_pad - B), (0, 0)))
    z = z.astype(w1.dtype)               # bf16 feed to the MXU

    grid = (B_pad // tile_b,)

    def const(shape):
        # Weights/biases: same block every grid step -> stay resident in VMEM.
        # (Default double-buffering of these ~1.3 MB of constants still fits
        # v7x's 32 MiB scoped VMEM alongside the largest out/intermediate
        # buffers, so no single-buffer pipeline_mode override is needed.)
        return pl.BlockSpec(shape, lambda i: (0, 0))

    out_bytes = jnp.dtype(out_dtype).itemsize
    flops = 2 * B_pad * (Z_SIZE * H1 + H1 * H2 + H2 * OUT)
    bytes_accessed = (
        (w1.size + w2.size + w3.size) * 2                      # bf16 weights
        + (b1.size + b2.size + b3.size) * 4                    # f32 biases
        + B_pad * (Z_SIZE * 2 + OUT * out_bytes)               # z in, out
    )

    out2d = pl.pallas_call(
        _mlp_kernel,
        out_shape=jax.ShapeDtypeStruct((B_pad, OUT), out_dtype),
        grid=grid,
        in_specs=[
            pl.BlockSpec((tile_b, Z_SIZE), lambda i: (i, 0)),
            const((Z_SIZE, H1)), const((1, H1)),
            const((H1, H2)),     const((1, H2)),
            const((H2, OUT)),    const((1, OUT)),
        ],
        out_specs=pl.BlockSpec((tile_b, OUT), lambda i: (i, 0)),
        compiler_params=pltpu.CompilerParams(
            dimension_semantics=("parallel",),
            vmem_limit_bytes=32 << 20,
        ),
        cost_estimate=pl.CostEstimate(
            flops=flops, transcendentals=0, bytes_accessed=bytes_accessed),
    )(z, w1, b1, w2, b2, w3, b3)

    # Only batch padding (if any) is sliced off; no lane-dim slice, so when B
    # is already a tile multiple there is no extra HBM pass at all.
    if B_pad != B:
        out2d = out2d[:B]
    return out2d[:, :, None]


def generator_forward(params, batch_size, key, *, out_dtype=jnp.float32):
    """Matches Generator.forward(batch_size): draws z ~ N(0, 1) internally."""
    z = jax.random.normal(key, (batch_size, Z_SIZE), dtype=jnp.float32)
    return generator_apply(z, params, out_dtype=out_dtype)


def init_params(key):
    """Kaiming-uniform-like init matching nn.Linear(32,256)/(256,512)/(512,1000).
    Weights stored (in, out) in bf16; biases (1, out) in f32."""
    ks = jax.random.split(key, 6)

    def linear(kw, kb, fan_in, fan_out):
        bound = 1.0 / jnp.sqrt(fan_in)
        w = jax.random.uniform(kw, (fan_in, fan_out), jnp.float32, -bound, bound)
        b = jax.random.uniform(kb, (1, fan_out), jnp.float32, -bound, bound)
        return w, b

    w1, b1 = linear(ks[0], ks[1], Z_SIZE, H1)
    w2, b2 = linear(ks[2], ks[3], H1, H2)
    w3, b3 = linear(ks[4], ks[5], H2, OUT)

    return (w1.astype(jnp.bfloat16), b1,
            w2.astype(jnp.bfloat16), b2,
            w3.astype(jnp.bfloat16), b3)


def _reference(z, params):
    """Plain-JAX reference using the same bf16 weights / f32 accumulation."""
    w1, b1, w2, b2, w3, b3 = params
    zb = z.astype(jnp.bfloat16)
    h1 = jnp.maximum(
        jnp.dot(zb, w1, preferred_element_type=jnp.float32) + b1, 0.0
    ).astype(jnp.bfloat16)
    h2 = jnp.maximum(
        jnp.dot(h1, w2, preferred_element_type=jnp.float32) + b2, 0.0
    ).astype(jnp.bfloat16)
    h3 = jnp.dot(h2, w3, preferred_element_type=jnp.float32) + b3
    return h3[:, :, None]


if __name__ == "__main__":
    key = jax.random.PRNGKey(0)
    k_params, k_z1, k_z2, k_z3 = jax.random.split(key, 4)
    params = init_params(k_params)

    # --- small batch: single grid step, tile 16, minimal padding ---
    batch_size = 8
    z = jax.random.normal(k_z1, (batch_size, Z_SIZE), dtype=jnp.float32)
    out = jax.block_until_ready(generator_apply(z, params))
    assert out.shape == (batch_size, OUT, 1), out.shape
    assert out.dtype == jnp.float32
    ref = _reference(z, params)
    assert jnp.allclose(out, ref, atol=2e-2, rtol=2e-2)

    # --- ragged batch: tile 208 (round_up(200,16)), single step, 8 pad rows ---
    batch_size2 = 200
    z2 = jax.random.normal(k_z2, (batch_size2, Z_SIZE), dtype=jnp.float32)
    out2 = jax.block_until_ready(generator_apply(z2, params))
    assert out2.shape == (batch_size2, OUT, 1), out2.shape
    ref2 = _reference(z2, params)
    assert jnp.allclose(out2, ref2, atol=2e-2, rtol=2e-2)

    # --- multi-step grid: B=600 -> tile 304, 2 "parallel" steps ---
    batch_size3 = 600
    z3 = jax.random.normal(k_z3, (batch_size3, Z_SIZE), dtype=jnp.float32)
    out3 = jax.block_until_ready(generator_apply(z3, params))
    assert out3.shape == (batch_size3, OUT, 1), out3.shape
    ref3 = _reference(z3, params)
    assert jnp.allclose(out3, ref3, atol=2e-2, rtol=2e-2)

    # --- bf16 output path (halves output writeback) ---
    out_bf16 = jax.block_until_ready(
        generator_apply(z, params, out_dtype=jnp.bfloat16))
    assert out_bf16.shape == (batch_size, OUT, 1)
    assert out_bf16.dtype == jnp.bfloat16
    assert jnp.allclose(out_bf16.astype(jnp.float32), ref, atol=3e-2, rtol=3e-2)

    # --- semantics-matching entry point (draws z internally) ---
    out4 = jax.block_until_ready(generator_forward(params, 4, jax.random.PRNGKey(7)))
    assert out4.shape == (4, OUT, 1)

    print("KERNEL_OK")
</pallas_src>

<mosaic_0001>
module attributes {stable_mosaic.version = 11 : i64} {
  func.func @_mlp_kernel(%arg0: i32, %arg1: memref<16x32xbf16, #tpu.memory_space<vmem>>, %arg2: memref<32x256xbf16, #tpu.memory_space<vmem>>, %arg3: memref<1x256xf32, #tpu.memory_space<vmem>>, %arg4: memref<256x512xbf16, #tpu.memory_space<vmem>>, %arg5: memref<1x512xf32, #tpu.memory_space<vmem>>, %arg6: memref<512x1000xbf16, #tpu.memory_space<vmem>>, %arg7: memref<1x1000xf32, #tpu.memory_space<vmem>>, %arg8: memref<16x1000xf32, #tpu.memory_space<vmem>>) attributes {dimension_semantics = [#tpu.dimension_semantics<parallel>], iteration_bounds = array<i64: 1>, scalar_prefetch = 0 : i64, scratch_operands = 0 : i64, tpu.core_type = #tpu.core_type<tc>, window_params = [{transform_indices = @transform_0, window_bounds = array<i64: 16, 32>}, {pipeline_mode = #tpu.pipeline_mode<synchronous>, transform_indices = @transform_1, window_bounds = array<i64: 32, 256>}, {pipeline_mode = #tpu.pipeline_mode<synchronous>, transform_indices = @transform_2, window_bounds = array<i64: 1, 256>}, {pipeline_mode = #tpu.pipeline_mode<synchronous>, transform_indices = @transform_3, window_bounds = array<i64: 256, 512>}, {pipeline_mode = #tpu.pipeline_mode<synchronous>, transform_indices = @transform_4, window_bounds = array<i64: 1, 512>}, {pipeline_mode = #tpu.pipeline_mode<synchronous>, transform_indices = @transform_5, window_bounds = array<i64: 512, 1000>}, {pipeline_mode = #tpu.pipeline_mode<synchronous>, transform_indices = @transform_6, window_bounds = array<i64: 1, 1000>}, {transform_indices = @transform_7, window_bounds = array<i64: 16, 1000>}]} {
    %c0 = arith.constant 0 : index
    %c0_0 = arith.constant 0 : index
    %0 = vector.load %arg1[%c0, %c0_0] : memref<16x32xbf16, #tpu.memory_space<vmem>>, vector<16x32xbf16>
    %c0_1 = arith.constant 0 : index
    %c0_2 = arith.constant 0 : index
    %1 = vector.load %arg2[%c0_1, %c0_2] : memref<32x256xbf16, #tpu.memory_space<vmem>>, vector<32x256xbf16>
    %cst = arith.constant dense<0.000000e+00> : vector<16x256xf32>
    %2 = tpu.matmul %0, %1, %cst {dimension_numbers = #tpu.dot_dimension_numbers<[1], [0], [0], [1], [0, 0, 1, 1], [], []>} : vector<16x32xbf16>, vector<32x256xbf16>, vector<16x256xf32> -> vector<16x256xf32>
    %c0_3 = arith.constant 0 : index
    %c0_4 = arith.constant 0 : index
    %3 = vector.load %arg3[%c0_3, %c0_4] : memref<1x256xf32, #tpu.memory_space<vmem>>, vector<1x256xf32>
    %4 = vector.broadcast %3 : vector<1x256xf32> to vector<16x256xf32>
    %5 = arith.addf %2, %4 : vector<16x256xf32>
    %cst_5 = arith.constant 0.000000e+00 : f32
    %6 = vector.broadcast %cst_5 : f32 to vector<16x256xf32>
    %7 = arith.maximumf %5, %6 : vector<16x256xf32>
    %8 = arith.truncf %7 : vector<16x256xf32> to vector<16x256xbf16>
    %c0_6 = arith.constant 0 : index
    %c0_7 = arith.constant 0 : index
    %9 = vector.load %arg4[%c0_6, %c0_7] : memref<256x512xbf16, #tpu.memory_space<vmem>>, vector<256x512xbf16>
    %cst_8 = arith.constant dense<0.000000e+00> : vector<16x512xf32>
    %10 = tpu.matmul %8, %9, %cst_8 {dimension_numbers = #tpu.dot_dimension_numbers<[1], [0], [0], [1], [0, 0, 1, 1], [], []>} : vector<16x256xbf16>, vector<256x512xbf16>, vector<16x512xf32> -> vector<16x512xf32>
    %c0_9 = arith.constant 0 : index
    %c0_10 = arith.constant 0 : index
    %11 = vector.load %arg5[%c0_9, %c0_10] : memref<1x512xf32, #tpu.memory_space<vmem>>, vector<1x512xf32>
    %12 = vector.broadcast %11 : vector<1x512xf32> to vector<16x512xf32>
    %13 = arith.addf %10, %12 : vector<16x512xf32>
    %cst_11 = arith.constant 0.000000e+00 : f32
    %14 = vector.broadcast %cst_11 : f32 to vector<16x512xf32>
    %15 = arith.maximumf %13, %14 : vector<16x512xf32>
    %16 = arith.truncf %15 : vector<16x512xf32> to vector<16x512xbf16>
    %c0_12 = arith.constant 0 : index
    %c0_13 = arith.constant 0 : index
    %17 = vector.load %arg6[%c0_12, %c0_13] : memref<512x1000xbf16, #tpu.memory_space<vmem>>, vector<512x1000xbf16>
    %cst_14 = arith.constant dense<0.000000e+00> : vector<16x1000xf32>
    %18 = tpu.matmul %16, %17, %cst_14 {dimension_numbers = #tpu.dot_dimension_numbers<[1], [0], [0], [1], [0, 0, 1, 1], [], []>} : vector<16x512xbf16>, vector<512x1000xbf16>, vector<16x1000xf32> -> vector<16x1000xf32>
    %c0_15 = arith.constant 0 : index
    %c0_16 = arith.constant 0 : index
    %19 = vector.load %arg7[%c0_15, %c0_16] : memref<1x1000xf32, #tpu.memory_space<vmem>>, vector<1x1000xf32>
    %20 = vector.broadcast %19 : vector<1x1000xf32> to vector<16x1000xf32>
    %21 = arith.addf %18, %20 : vector<16x1000xf32>
    %c0_17 = arith.constant 0 : index
    %c0_18 = arith.constant 0 : index
    %22 = vector.load %arg8[%c0_17, %c0_18] : memref<16x1000xf32, #tpu.memory_space<vmem>>, vector<16x1000xf32>
    tpu.vector_store %arg8[%c0_17, %c0_18], %21 {strides = array<i32>} : memref<16x1000xf32, #tpu.memory_space<vmem>>, vector<16x1000xf32>,
    return
  }
  func.func @transform_0(%arg0: i32) -> (i32, i32) {
    %c0_i32 = arith.constant 0 : i32
    %c0_i32_0 = arith.constant 0 : i32
    return %arg0, %c0_i32 : i32, i32
  }
  func.func @transform_1(%arg0: i32) -> (i32, i32) {
    %c0_i32 = arith.constant 0 : i32
    %c0_i32_0 = arith.constant 0 : i32
    %c0_i32_1 = arith.constant 0 : i32
    return %c0_i32, %c0_i32_0 : i32, i32
  }
  func.func @transform_2(%arg0: i32) -> (i32, i32) {
    %c0_i32 = arith.constant 0 : i32
    %c0_i32_0 = arith.constant 0 : i32
    %c0_i32_1 = arith.constant 0 : i32
    return %c0_i32, %c0_i32_0 : i32, i32
  }
  func.func @transform_3(%arg0: i32) -> (i32, i32) {
    %c0_i32 = arith.constant 0 : i32
    %c0_i32_0 = arith.constant 0 : i32
    %c0_i32_1 = arith.constant 0 : i32
    return %c0_i32, %c0_i32_0 : i32, i32
  }
  func.func @transform_4(%arg0: i32) -> (i32, i32) {
    %c0_i32 = arith.constant 0 : i32
    %c0_i32_0 = arith.constant 0 : i32
    %c0_i32_1 = arith.constant 0 : i32
    return %c0_i32, %c0_i32_0 : i32, i32
  }
  func.func @transform_5(%arg0: i32) -> (i32, i32) {
    %c0_i32 = arith.constant 0 : i32
    %c0_i32_0 = arith.constant 0 : i32
    %c0_i32_1 = arith.constant 0 : i32
    return %c0_i32, %c0_i32_0 : i32, i32
  }
  func.func @transform_6(%arg0: i32) -> (i32, i32) {
    %c0_i32 = arith.constant 0 : i32
    %c0_i32_0 = arith.constant 0 : i32
    %c0_i32_1 = arith.constant 0 : i32
    return %c0_i32, %c0_i32_0 : i32, i32
  }
  func.func @transform_7(%arg0: i32) -> (i32, i32) {
    %c0_i32 = arith.constant 0 : i32
    %c0_i32_0 = arith.constant 0 : i32
    return %arg0, %c0_i32 : i32, i32
  }
}

</mosaic_0001>

<bundles_post_ra>
// kernel: tpu_custom_call.1
= control target key start
LH: loop header
LB: loop body
LE: loop exit
PB: predicated region body
PF: predicated region fallthrough
CT: control target
= control target key end

     0   :  { %vm65_vm0 = vcmask 261120   ;;  %s6390_s0 = inlined_call_operand.vmem [shape: bf16[16,32], index: 0, kind: input, shape index: {}]   ;;  %s6391_s1 = inlined_call_operand.vmem [shape: bf16[32,256], index: 1, kind: input, shape index: {}]   ;;  %s6392_s2 = inlined_call_operand.vmem [shape: f32[1,256], index: 2, kind: input, shape index: {}]   ;;  %s6393_s3 = inlined_call_operand.vmem [shape: bf16[256,512], index: 3, kind: input, shape index: {}]   ;;  %s6394_s4 = inlined_call_operand.vmem [shape: f32[1,512], index: 4, kind: input, shape index: {}]   ;;  %s6395_s5 = inlined_call_operand.vmem [shape: bf16[512,1000], index: 5, kind: input, shape index: {}]   ;;  %s6396_s6 = inlined_call_operand.vmem [shape: f32[1,1000], index: 6, kind: input, shape index: {}]   ;;  %s6397_s7 = inlined_call_operand.hbm [shape: f32[16,1000], index: 7, kind: output, shape index: {}]  }
   0x1   :  { %v2672_v0 = vld [vmem:[%s6391_s1 + $0x10] sm:$0xf]  ;;  %v3964_v1 = vld [vmem:[%s6391_s1 + $0x14] sm:$0xf0]  ;;  %v3963_v2 = vld [vmem:[%s6391_s1 + $0x14] sm:$0xf] }
   0x2   :  { %v2673_v3 = vor.u32 %v3964_v1, %v2672_v0  ;;  %v2674_v4 = vld [vmem:[%s6391_s1 + $0x18] sm:$0xf0]  ;;  %v2664_v5 = vld [vmem:[%s6391_s1] sm:$0xf]  ;;  %v3962_v6 = vld [vmem:[%s6391_s1 + $0x4] sm:$0xf0] }
   0x3   :  { %v2677_v7 = vor.u32 %v3963_v2, %v2674_v4  ;;  %v3961_v8 = vld [vmem:[%s6391_s1 + $0x4] sm:$0xf]  ;;  %v2666_v9 = vld [vmem:[%s6391_s1 + $0x8] sm:$0xf0]  ;;  %v2665_v10 = vor.u32 %v3962_v6, %v2664_v5  ;;  %v2794_v11 = vld [vmem:[%s6393_s3 + $0xe0] sm:$0xf] }
   0x4   :  { %75 = vmatpush.bf16.msra.mxu0 %v2673_v3  ;;  %v3995_v12 = vld [vmem:[%s6393_s3 + $0xec] sm:$0xf0]  ;;  %v2922_v13 = vld [vmem:[%s6393_s3 + $0x1e0] sm:$0xf]  ;;  %v2669_v14 = vor.u32 %v3961_v8, %v2666_v9  ;;  %v3993_v18 = vld [vmem:[%s6393_s3 + $0xe4] sm:$0xf] }
   0x5   :  { %89 = vmatpush.bf16.msra.mxu1 %v2677_v7  ;;  %v3960_v15 = vld [vmem:[%s6390_s0] sm:$0xff]  ;;  %v2795_v16 = vor.u32 %v3995_v12, %v2794_v11  ;;  %v4027_v17 = vld [vmem:[%s6393_s3 + $0x1ec] sm:$0xf0]  ;;  %v2796_v19 = vld [vmem:[%s6393_s3 + $0xf0] sm:$0xf0] }
   0x6   :  { %v2923_v20 = vor.u32 %v4027_v17, %v2922_v13  ;;  %v2799_v21 = vor.u32 %v3993_v18, %v2796_v19  ;;  %v4025_v22 = vld [vmem:[%s6393_s3 + $0x1e4] sm:$0xf]  ;;  %v2924_v23 = vld [vmem:[%s6393_s3 + $0x1f0] sm:$0xf0]  ;;  %v2778_v24 = vld [vmem:[%s6393_s3 + $0xc0] sm:$0xf] }
   0x7   :  { %497 = vmatpush.bf16.msra.mxu2 %v2795_v16  ;;  %v2927_v25 = vor.u32 %v4025_v22, %v2924_v23  ;;  %v3991_v26 = vld [vmem:[%s6393_s3 + $0xcc] sm:$0xf0]  ;;  %v2906_v27 = vld [vmem:[%s6393_s3 + $0x1c0] sm:$0xf]  ;;  %v3989_v31 = vld [vmem:[%s6393_s3 + $0xc4] sm:$0xf] }
   0x8   :  { %v4023_v28 = vld [vmem:[%s6393_s3 + $0x1cc] sm:$0xf0]  ;;  %76 = vmatpush.bf16.msra.mxu0 %v2665_v10  ;;  %511 = vmatpush.bf16.msra.mxu3 %v2923_v20  ;;  %v2779_v29 = vor.u32 %v3991_v26, %v2778_v24  ;;  %v2780_v32 = vld [vmem:[%s6393_s3 + $0xd0] sm:$0xf0]  ;;  %v4021_v33 = vld [vmem:[%s6393_s3 + $0x1c4] sm:$0xf] }
   0x9   :  { %v2907_v30 = vor.u32 %v4023_v28, %v2906_v27  ;;  %90 = vmatpush.bf16.msra.mxu1 %v2669_v14  ;;  %v2783_v34 = vor.u32 %v3989_v31, %v2780_v32  ;;  %v2908_v35 = vld [vmem:[%s6393_s3 + $0x1d0] sm:$0xf0]  ;;  %v2762_v36 = vld [vmem:[%s6393_s3 + $0xa0] sm:$0xf]  ;;  %v3987_v37 = vld [vmem:[%s6393_s3 + $0xac] sm:$0xf0] }
   0xa   :  { %v2911_v38 = vor.u32 %v4021_v33, %v2908_v35  ;;  %v2890_v39 = vld [vmem:[%s6393_s3 + $0x1a0] sm:$0xf]  ;;  %v4019_v40 = vld [vmem:[%s6393_s3 + $0x1ac] sm:$0xf0]  ;;  %v3985_v41 = vld [vmem:[%s6393_s3 + $0xa4] sm:$0xf]  ;;  %v2763_v42 = vor.u32 %v3987_v37, %v2762_v36 }
   0xb   :  { %2678 = vmatmul.msk.bf16.vlgmr.msra.gmra.mxu0 %vm65_vm0, %v3960_v15  ;;  %498 = vmatpush.bf16.msra.mxu2 %v2779_v29  ;;  %v2764_v43 = vld [vmem:[%s6393_s3 + $0xb0] sm:$0xf0]  ;;  %v4017_v44 = vld [vmem:[%s6393_s3 + $0x1a4] sm:$0xf]  ;;  %v2891_v46 = vor.u32 %v4019_v40, %v2890_v39  ;;  %v2746_v47 = vld [vmem:[%s6393_s3 + $0x80] sm:$0xf] }
   0xc   :  { %525 = vmatpush.bf16.msrb.mxu0 %v2799_v21  ;;  %v2892_v45 = vld [vmem:[%s6393_s3 + $0x1b0] sm:$0xf0]  ;;  %2679 = vmatmul.msk.bf16.vlgmr.msra.gmra.mxu1 %vm65_vm0, %v3960_v15  ;;  %v3983_v48 = vld [vmem:[%s6393_s3 + $0x8c] sm:$0xf0]  ;;  %v2767_v49 = vor.u32 %v3985_v41, %v2764_v43  ;;  %v2874_v50 = vld [vmem:[%s6393_s3 + $0x180] sm:$0xf] }
   0xd   :  { %539 = vmatpush.bf16.msrb.mxu1 %v2927_v25  ;;  %512 = vmatpush.bf16.msra.mxu3 %v2907_v30  ;;  %v4015_v51 = vld [vmem:[%s6393_s3 + $0x18c] sm:$0xf0]  ;;  %v2895_v52 = vor.u32 %v4017_v44, %v2892_v45  ;;  %v3981_v53 = vld [vmem:[%s6393_s3 + $0x84] sm:$0xf]  ;;  %v2748_v54 = vld [vmem:[%s6393_s3 + $0x90] sm:$0xf0]  ;;  %v2747_v55 = vor.u32 %v3983_v48, %v2746_v47 }
   0xe   :  { %v4013_v56 = vld [vmem:[%s6393_s3 + $0x184] sm:$0xf]  ;;  %v2876_v57 = vld [vmem:[%s6393_s3 + $0x190] sm:$0xf0]  ;;  %v2875_v58 = vor.u32 %v4015_v51, %v2874_v50  ;;  %v2730_v59 = vld [vmem:[%s6393_s3 + $0x60] sm:$0xf]  ;;  %v2751_v61 = vor.u32 %v3981_v53, %v2748_v54 }
   0xf   :  { %499 = vmatpush.bf16.msra.mxu2 %v2763_v42  ;;  %v3979_v60 = vld [vmem:[%s6393_s3 + $0x6c] sm:$0xf0]  ;;  %v2858_v62 = vld [vmem:[%s6393_s3 + $0x160] sm:$0xf]  ;;  %v2879_v0 = vor.u32 %v4013_v56, %v2876_v57  ;;  %v3977_v1 = vld [vmem:[%s6393_s3 + $0x64] sm:$0xf] }
  0x10   :  { %526 = vmatpush.bf16.msrb.mxu0 %v2783_v34  ;;  %v4011_v63 = vld [vmem:[%s6393_s3 + $0x16c] sm:$0xf0]  ;;  %v2732_v2 = vld [vmem:[%s6393_s3 + $0x70] sm:$0xf0]  ;;  %v2731_v3 = vor.u32 %v3979_v60, %v2730_v59  ;;  %v4009_v4 = vld [vmem:[%s6393_s3 + $0x164] sm:$0xf] }
  0x11   :  { %540 = vmatpush.bf16.msrb.mxu1 %v2911_v38  ;;  %513 = vmatpush.bf16.msra.mxu3 %v2891_v46  ;;  %v2860_v5 = vld [vmem:[%s6393_s3 + $0x170] sm:$0xf0]  ;;  %v2859_v6 = vor.u32 %v4011_v63, %v2858_v62  ;;  %v2714_v7 = vld [vmem:[%s6393_s3 + $0x40] sm:$0xf]  ;;  %v3975_v8 = vld [vmem:[%s6393_s3 + $0x4c] sm:$0xf0]  ;;  %v2735_v9 = vor.u32 %v3977_v1, %v2732_v2 }
  0x12   :  { %v2842_v10 = vld [vmem:[%s6393_s3 + $0x140] sm:$0xf]  ;;  %v4007_v11 = vld [vmem:[%s6393_s3 + $0x14c] sm:$0xf0]  ;;  %v2863_v12 = vor.u32 %v4009_v4, %v2860_v5  ;;  %v3973_v13 = vld [vmem:[%s6393_s3 + $0x44] sm:$0xf]  ;;  %v2715_v15 = vor.u32 %v3975_v8, %v2714_v7 }
  0x13   :  { %500 = vmatpush.bf16.msra.mxu2 %v2747_v55  ;;  %v2716_v14 = vld [vmem:[%s6393_s3 + $0x50] sm:$0xf0]  ;;  %v4005_v16 = vld [vmem:[%s6393_s3 + $0x144] sm:$0xf]  ;;  %v2843_v18 = vor.u32 %v4007_v11, %v2842_v10  ;;  %v2698_v19 = vld [vmem:[%s6393_s3 + $0x20] sm:$0xf] }
  0x14   :  { %527 = vmatpush.bf16.msrb.mxu0 %v2767_v49  ;;  %v2844_v17 = vld [vmem:[%s6393_s3 + $0x150] sm:$0xf0]  ;;  %v3971_v20 = vld [vmem:[%s6393_s3 + $0x2c] sm:$0xf0]  ;;  %v2719_v21 = vor.u32 %v3973_v13, %v2716_v14  ;;  %v2826_v22 = vld [vmem:[%s6393_s3 + $0x120] sm:$0xf] }
  0x15   :  { %541 = vmatpush.bf16.msrb.mxu1 %v2895_v52  ;;  %514 = vmatpush.bf16.msra.mxu3 %v2875_v58  ;;  %v4003_v23 = vld [vmem:[%s6393_s3 + $0x12c] sm:$0xf0] }
  0x17   :  { %501 = vmatpush.bf16.msra.mxu2 %v2731_v3 }
  0x18   :  { %528 = vmatpush.bf16.msrb.mxu0 %v2751_v61 }
  0x19   :  { %542 = vmatpush.bf16.msrb.mxu1 %v2879_v0  ;;  %515 = vmatpush.bf16.msra.mxu3 %v2859_v6 }
  0x1c   :  { %529 = vmatpush.bf16.msrb.mxu0 %v2735_v9 }
  0x1d   :  { %12 = vsyncpa [#allocation3], 0  ;;  %543 = vmatpush.bf16.msrb.mxu1 %v2863_v12  ;;  %v2847_v24 = vor.u32 %v4005_v16, %v2844_v17  ;;  %v3969_v25 = vld [vmem:[%s6393_s3 + $0x24] sm:$0xf]  ;;  %v2700_v26 = vld [vmem:[%s6393_s3 + $0x30] sm:$0xf0]  ;;  %502 = vmatpush.bf16.msra.mxu2 %v2715_v15  ;;  %v2699_v27 = vor.u32 %v3971_v20, %v2698_v19  ;;  %v2827_v30 = vor.u32 %v4003_v23, %v2826_v22 }
  0x1e   :  { %v4001_v28 = vld [vmem:[%s6393_s3 + $0x124] sm:$0xf]  ;;  %v2828_v29 = vld [vmem:[%s6393_s3 + $0x130] sm:$0xf0]  ;;  %516 = vmatpush.bf16.msra.mxu3 %v2843_v18  ;;  %v2682_v31 = vld [vmem:[%s6393_s3] sm:$0xf]  ;;  %v2703_v33 = vor.u32 %v3969_v25, %v2700_v26 }
  0x1f   :  { %v3967_v32 = vld [vmem:[%s6393_s3 + $0xc] sm:$0xf0]  ;;  %v2810_v34 = vld [vmem:[%s6393_s3 + $0x100] sm:$0xf]  ;;  %v2831_v36 = vor.u32 %v4001_v28, %v2828_v29  ;;  %v3965_v37 = vld [vmem:[%s6393_s3 + $0x4] sm:$0xf] }
  0x20   :  { %530 = vmatpush.bf16.msrb.mxu0 %v2719_v21  ;;  %v3999_v35 = vld [vmem:[%s6393_s3 + $0x10c] sm:$0xf0]  ;;  %v2684_v38 = vld [vmem:[%s6393_s3 + $0x10] sm:$0xf0]  ;;  %v2683_v39 = vor.u32 %v3967_v32, %v2682_v31  ;;  %v3997_v40 = vld [vmem:[%s6393_s3 + $0x104] sm:$0xf] }
  0x21   :  { %544 = vmatpush.bf16.msrb.mxu1 %v2847_v24  ;;  %503 = vmatpush.bf16.msra.mxu2 %v2699_v27  ;;  %v2812_v41 = vld [vmem:[%s6393_s3 + $0x110] sm:$0xf0]  ;;  %v2811_v42 = vor.u32 %v3999_v35, %v2810_v34  ;;  %v2687_v43 = vor.u32 %v3965_v37, %v2684_v38  ;;  %v2802_v45 = vld [vmem:[%s6393_s3 + $0xe8] sm:$0xf]  ;;  %v3996_v46 = vld [vmem:[%s6393_s3 + $0xf4] sm:$0xf0] }
  0x22   :  { %517 = vmatpush.bf16.msra.mxu3 %v2827_v30  ;;  %v2815_v44 = vor.u32 %v3997_v40, %v2812_v41  ;;  %v2930_v47 = vld [vmem:[%s6393_s3 + $0x1e8] sm:$0xf]  ;;  %v2803_v48 = vor.u32 %v3996_v46, %v2802_v45  ;;  %v4028_v49 = vld [vmem:[%s6393_s3 + $0x1f4] sm:$0xf0]  ;;  %v3994_v50 = vld [vmem:[%s6393_s3 + $0xec] sm:$0xf] }
  0x23   :  { %v2804_v51 = vld [vmem:[%s6393_s3 + $0xf8] sm:$0xf0]  ;;  %v2931_v52 = vor.u32 %v4028_v49, %v2930_v47  ;;  %v4026_v54 = vld [vmem:[%s6393_s3 + $0x1ec] sm:$0xf]  ;;  %v2786_v57 = vld [vmem:[%s6393_s3 + $0xc8] sm:$0xf] }
  0x24   :  { %531 = vmatpush.bf16.msrb.mxu0 %v2703_v33  ;;  %v2807_v53 = vor.u32 %v3994_v50, %v2804_v51  ;;  %v2932_v55 = vld [vmem:[%s6393_s3 + $0x1f8] sm:$0xf0]  ;;  %v3992_v58 = vld [vmem:[%s6393_s3 + $0xd4] sm:$0xf0]  ;;  %v2914_v60 = vld [vmem:[%s6393_s3 + $0x1c8] sm:$0xf] }
  0x25   :  { %545 = vmatpush.bf16.msrb.mxu1 %v2831_v36  ;;  %504 = vmatpush.bf16.msra.mxu2 %v2683_v39  ;;  %v2935_v56 = vor.u32 %v4026_v54, %v2932_v55  ;;  %v2787_v59 = vor.u32 %v3992_v58, %v2786_v57  ;;  %v4024_v61 = vld [vmem:[%s6393_s3 + $0x1d4] sm:$0xf0]  ;;  %v3990_v62 = vld [vmem:[%s6393_s3 + $0xcc] sm:$0xf]  ;;  %v2788_v0 = vld [vmem:[%s6393_s3 + $0xd8] sm:$0xf0] }
  0x26   :  { %518 = vmatpush.bf16.msra.mxu3 %v2811_v42  ;;  %v2915_v63 = vor.u32 %v4024_v61, %v2914_v60  ;;  %v4022_v1 = vld [vmem:[%s6393_s3 + $0x1cc] sm:$0xf]  ;;  %v2916_v2 = vld [vmem:[%s6393_s3 + $0x1d8] sm:$0xf0]  ;;  %v2791_v3 = vor.u32 %v3990_v62, %v2788_v0  ;;  %v2770_v5 = vld [vmem:[%s6393_s3 + $0xa8] sm:$0xf] }
  0x27   :  { %v2919_v4 = vor.u32 %v4022_v1, %v2916_v2  ;;  %v3988_v6 = vld [vmem:[%s6393_s3 + $0xb4] sm:$0xf0]  ;;  %v2898_v7 = vld [vmem:[%s6393_s3 + $0x1a8] sm:$0xf]  ;;  %v3986_v10 = vld [vmem:[%s6393_s3 + $0xac] sm:$0xf] }
  0x28   :  { %532 = vmatpush.bf16.msrb.mxu0 %v2687_v43  ;;  %v2771_v8 = vor.u32 %v3988_v6, %v2770_v5  ;;  %v4020_v9 = vld [vmem:[%s6393_s3 + $0x1b4] sm:$0xf0]  ;;  %v2772_v11 = vld [vmem:[%s6393_s3 + $0xb8] sm:$0xf0]  ;;  %v4018_v14 = vld [vmem:[%s6393_s3 + $0x1ac] sm:$0xf] }
  0x29   :  { %546 = vmatpush.bf16.msrb.mxu1 %v2815_v44  ;;  %553 = vmatpush.bf16.msrb.mxu2 %v2803_v48  ;;  %v2899_v12 = vor.u32 %v4020_v9, %v2898_v7  ;;  %v2775_v13 = vor.u32 %v3986_v10, %v2772_v11  ;;  %v2900_v15 = vld [vmem:[%s6393_s3 + $0x1b8] sm:$0xf0]  ;;  %v2754_v17 = vld [vmem:[%s6393_s3 + $0x88] sm:$0xf]  ;;  %v3984_v18 = vld [vmem:[%s6393_s3 + $0x94] sm:$0xf0] }
  0x2a   :  { %567 = vmatpush.bf16.msrb.mxu3 %v2931_v52  ;;  %v2903_v16 = vor.u32 %v4018_v14, %v2900_v15  ;;  %v2882_v19 = vld [vmem:[%s6393_s3 + $0x188] sm:$0xf]  ;;  %v2755_v20 = vor.u32 %v3984_v18, %v2754_v17  ;;  %v4016_v21 = vld [vmem:[%s6393_s3 + $0x194] sm:$0xf0]  ;;  %v3982_v22 = vld [vmem:[%s6393_s3 + $0x8c] sm:$0xf] }
  0x2b   :  { %v2756_v23 = vld [vmem:[%s6393_s3 + $0x98] sm:$0xf0]  ;;  %v2883_v24 = vor.u32 %v4016_v21, %v2882_v19  ;;  %v4014_v26 = vld [vmem:[%s6393_s3 + $0x18c] sm:$0xf]  ;;  %v2738_v29 = vld [vmem:[%s6393_s3 + $0x68] sm:$0xf] }
  0x2c   :  { %581 = vmatpush.bf16.msra.mxu0 %v2807_v53  ;;  %v2759_v25 = vor.u32 %v3982_v22, %v2756_v23  ;;  %v2884_v27 = vld [vmem:[%s6393_s3 + $0x198] sm:$0xf0]  ;;  %v3980_v30 = vld [vmem:[%s6393_s3 + $0x74] sm:$0xf0]  ;;  %v2866_v31 = vld [vmem:[%s6393_s3 + $0x168] sm:$0xf] }
  0x2d   :  { %595 = vmatpush.bf16.msra.mxu1 %v2935_v56  ;;  %554 = vmatpush.bf16.msrb.mxu2 %v2787_v59  ;;  %v2887_v28 = vor.u32 %v4014_v26, %v2884_v27  ;;  %v2739_v32 = vor.u32 %v3980_v30, %v2738_v29  ;;  %v4012_v33 = vld [vmem:[%s6393_s3 + $0x174] sm:$0xf0]  ;;  %v3978_v34 = vld [vmem:[%s6393_s3 + $0x6c] sm:$0xf]  ;;  %v2740_v35 = vld [vmem:[%s6393_s3 + $0x78] sm:$0xf0] }
  0x2e   :  { %568 = vmatpush.bf16.msrb.mxu3 %v2915_v63  ;;  %v2867_v36 = vor.u32 %v4012_v33, %v2866_v31  ;;  %v2743_v37 = vor.u32 %v3978_v34, %v2740_v35  ;;  %v4010_v38 = vld [vmem:[%s6393_s3 + $0x16c] sm:$0xf]  ;;  %v2868_v39 = vld [vmem:[%s6393_s3 + $0x178] sm:$0xf0]  ;;  %v2722_v40 = vld [vmem:[%s6393_s3 + $0x48] sm:$0xf] }
  0x2f   :  { %v2871_v41 = vor.u32 %v4010_v38, %v2868_v39  ;;  %v3976_v42 = vld [vmem:[%s6393_s3 + $0x54] sm:$0xf0]  ;;  %v2850_v43 = vld [vmem:[%s6393_s3 + $0x148] sm:$0xf]  ;;  %v3974_v47 = vld [vmem:[%s6393_s3 + $0x4c] sm:$0xf] }
  0x30   :  { %582 = vmatpush.bf16.msra.mxu0 %v2791_v3  ;;  %v4008_v44 = vld [vmem:[%s6393_s3 + $0x154] sm:$0xf0]  ;;  %v2723_v45 = vor.u32 %v3976_v42, %v2722_v40  ;;  %v2724_v48 = vld [vmem:[%s6393_s3 + $0x58] sm:$0xf0]  ;;  %v4006_v49 = vld [vmem:[%s6393_s3 + $0x14c] sm:$0xf] }
  0x31   :  { %596 = vmatpush.bf16.msra.mxu1 %v2919_v4  ;;  %555 = vmatpush.bf16.msrb.mxu2 %v2771_v8  ;;  %v2851_v46 = vor.u32 %v4008_v44, %v2850_v43  ;;  %v2727_v50 = vor.u32 %v3974_v47, %v2724_v48  ;;  %v2852_v51 = vld [vmem:[%s6393_s3 + $0x158] sm:$0xf0]  ;;  %v2706_v52 = vld [vmem:[%s6393_s3 + $0x28] sm:$0xf]  ;;  %v3972_v53 = vld [vmem:[%s6393_s3 + $0x34] sm:$0xf0] }
  0x32   :  { %569 = vmatpush.bf16.msrb.mxu3 %v2899_v12  ;;  %v2855_v54 = vor.u32 %v4006_v49, %v2852_v51  ;;  %v2834_v55 = vld [vmem:[%s6393_s3 + $0x128] sm:$0xf]  ;;  %v4004_v56 = vld [vmem:[%s6393_s3 + $0x134] sm:$0xf0]  ;;  %v3970_v57 = vld [vmem:[%s6393_s3 + $0x2c] sm:$0xf]  ;;  %v2707_v58 = vor.u32 %v3972_v53, %v2706_v52 }
  0x33   :  { %v2708_v59 = vld [vmem:[%s6393_s3 + $0x38] sm:$0xf0]  ;;  %v4002_v60 = vld [vmem:[%s6393_s3 + $0x12c] sm:$0xf]  ;;  %v2835_v62 = vor.u32 %v4004_v56, %v2834_v55  ;;  %v2690_v63 = vld [vmem:[%s6393_s3 + $0x8] sm:$0xf] }
  0x34   :  { %583 = vmatpush.bf16.msra.mxu0 %v2775_v13  ;;  %v2836_v61 = vld [vmem:[%s6393_s3 + $0x138] sm:$0xf0]  ;;  %v3968_v0 = vld [vmem:[%s6393_s3 + $0x14] sm:$0xf0]  ;;  %v2711_v1 = vor.u32 %v3970_v57, %v2708_v59  ;;  %v2818_v3 = vld [vmem:[%s6393_s3 + $0x108] sm:$0xf] }
  0x35   :  { %597 = vmatpush.bf16.msra.mxu1 %v2903_v16  ;;  %556 = vmatpush.bf16.msrb.mxu2 %v2755_v20  ;;  %v2839_v2 = vor.u32 %v4002_v60, %v2836_v61  ;;  %v4000_v4 = vld [vmem:[%s6393_s3 + $0x114] sm:$0xf0]  ;;  %v3966_v5 = vld [vmem:[%s6393_s3 + $0xc] sm:$0xf]  ;;  %v2692_v6 = vld [vmem:[%s6393_s3 + $0x18] sm:$0xf0]  ;;  %v2691_v9 = vor.u32 %v3968_v0, %v2690_v63 }
  0x36   :  { %570 = vmatpush.bf16.msrb.mxu3 %v2883_v24  ;;  %v3998_v7 = vld [vmem:[%s6393_s3 + $0x10c] sm:$0xf]  ;;  %v2820_v8 = vld [vmem:[%s6393_s3 + $0x118] sm:$0xf0]  ;;  %v2819_v10 = vor.u32 %v4000_v4, %v2818_v3  ;;  %v2695_v11 = vor.u32 %v3966_v5, %v2692_v6  ;;  %v34_v13 = vld [vmem:[%s6392_s2] sm:$0x3] }
  0x37   :  { %v2823_v12 = vor.u32 %v3998_v7, %v2820_v8  ;;  %v36_v16 = vperm.slane %v34_v13, 0  ;;  %v37_v17 = vperm.slane %v34_v13, 1  ;;  %v3418_v23 = vld [vmem:[%s6395_s5 + $0x3c0] sm:$0xf]  ;;  %vm2630_vm1 = vcmask 850944   ;;  %s2646_s24 = sshll.u32 %s6397_s7, 4  ;;  %s2647_s24 = int_to_ptr.hbm [resolvable:$true] %s2646_s24 }
  0x38   :  { %584 = vmatpush.bf16.msra.mxu0 %v2759_v25  ;;  %v4153_v24 = vld [vmem:[%s6395_s5 + $0x3dc] sm:$0xf0]  ;;  %s4315_s1 = smov 1024   ;;  %s4316_s25 = smov 64  }
  0x39   :  { %598 = vmatpush.bf16.msra.mxu1 %v2887_v28  ;;  %557 = vmatpush.bf16.msrb.mxu2 %v2739_v32  ;;  %v3162_v25 = vld [vmem:[%s6395_s5 + $0x1c0] sm:$0xf] }
  0x3a   :  { %571 = vmatpush.bf16.msrb.mxu3 %v2867_v36  ;;  %v4089_v27 = vld [vmem:[%s6395_s5 + $0x1dc] sm:$0xf0] }
  0x3b   :  { %v3930_v28 = vld [vmem:[%s6395_s5 + $0x7c0] sm:$0xf]  ;;  %v3163_v40 = vor.u32 %v4089_v27, %v3162_v25 }
  0x3c   :  { %585 = vmatpush.bf16.msra.mxu0 %v2743_v37  ;;  %v4281_v29 = vld [vmem:[%s6395_s5 + $0x7dc] sm:$0xf0]  ;;  %v3419_v37 = vor.u32 %v4153_v24, %v3418_v23 }
  0x3d   :  { %599 = vmatpush.bf16.msra.mxu1 %v2871_v41  ;;  %558 = vmatpush.bf16.msrb.mxu2 %v2723_v45  ;;  %v3674_v32 = vld [vmem:[%s6395_s5 + $0x5c0] sm:$0xf]  ;;  %v3931_v44 = vor.u32 %v4281_v29, %v3930_v28 }
  0x3e   :  { %572 = vmatpush.bf16.msrb.mxu3 %v2851_v46  ;;  %v4217_v33 = vld [vmem:[%s6395_s5 + $0x5dc] sm:$0xf0] }
  0x3f   :  { %v3386_v38 = vld [vmem:[%s6395_s5 + $0x380] sm:$0xf]  ;;  %v3675_v46 = vor.u32 %v4217_v33, %v3674_v32 }
  0x40   :  { %586 = vmatpush.bf16.msra.mxu0 %v2727_v50  ;;  %v4145_v39 = vld [vmem:[%s6395_s5 + $0x39c] sm:$0xf0] }
  0x41   :  { %600 = vmatpush.bf16.msra.mxu1 %v2855_v54  ;;  %559 = vmatpush.bf16.msrb.mxu2 %v2707_v58  ;;  %v3130_v42 = vld [vmem:[%s6395_s5 + $0x180] sm:$0xf]  ;;  %v3387_v50 = vor.u32 %v4145_v39, %v3386_v38 }
  0x42   :  { %573 = vmatpush.bf16.msrb.mxu3 %v2835_v62  ;;  %v4081_v43 = vld [vmem:[%s6395_s5 + $0x19c] sm:$0xf0] }
  0x43   :  { %v3898_v45 = vld [vmem:[%s6395_s5 + $0x780] sm:$0xf]  ;;  %v3131_v53 = vor.u32 %v4081_v43, %v3130_v42 }
  0x44   :  { %587 = vmatpush.bf16.msra.mxu0 %v2711_v1  ;;  %v4273_v47 = vld [vmem:[%s6395_s5 + $0x79c] sm:$0xf0] }
  0x45   :  { %601 = vmatpush.bf16.msra.mxu1 %v2839_v2  ;;  %560 = vmatpush.bf16.msrb.mxu2 %v2691_v9  ;;  %v3642_v48 = vld [vmem:[%s6395_s5 + $0x580] sm:$0xf]  ;;  %v3899_v56 = vor.u32 %v4273_v47, %v3898_v45  ;;  %v4149_v45 = vld [vmem:[%s6395_s5 + $0x3c4] sm:$0xf] }
  0x46   :  { %574 = vmatpush.bf16.msrb.mxu3 %v2819_v10  ;;  %v4209_v49 = vld [vmem:[%s6395_s5 + $0x59c] sm:$0xf0] }
  0x47   :  { %v3354_v51 = vld [vmem:[%s6395_s5 + $0x340] sm:$0xf]  ;;  %v3643_v58 = vor.u32 %v4209_v49, %v3642_v48  ;;  %v3420_v49 = vld [vmem:[%s6395_s5 + $0x3e0] sm:$0xf0] }
  0x48   :  { %588 = vmatpush.bf16.msra.mxu0 %v2695_v11  ;;  %v4137_v52 = vld [vmem:[%s6395_s5 + $0x35c] sm:$0xf0] }
  0x49   :  { %602 = vmatpush.bf16.msra.mxu1 %v2823_v12  ;;  %v3098_v54 = vld [vmem:[%s6395_s5 + $0x140] sm:$0xf]  ;;  %v3355_v62 = vor.u32 %v4137_v52, %v3354_v51  ;;  %v3164_v51 = vld [vmem:[%s6395_s5 + $0x1e0] sm:$0xf0] }
  0x4a   :  { %v4073_v55 = vld [vmem:[%s6395_s5 + $0x15c] sm:$0xf0] }
  0x4b   :  { %v3866_v57 = vld [vmem:[%s6395_s5 + $0x740] sm:$0xf]  ;;  %v3099_v1 = vor.u32 %v4073_v55, %v3098_v54  ;;  %v3423_v54 = vor.u32 %v4149_v45, %v3420_v49  ;;  %v4141_v55 = vld [vmem:[%s6395_s5 + $0x384] sm:$0xf] }
  0x4c   :  { %v4265_v59 = vld [vmem:[%s6395_s5 + $0x75c] sm:$0xf0] }
  0x4d   :  { %v3610_v60 = vld [vmem:[%s6395_s5 + $0x540] sm:$0xf]  ;;  %v3867_v4 = vor.u32 %v4265_v59, %v3866_v57  ;;  %v3388_v57 = vld [vmem:[%s6395_s5 + $0x3a0] sm:$0xf0] }
  0x4e   :  { %v4201_v61 = vld [vmem:[%s6395_s5 + $0x55c] sm:$0xf0]  ;;  %v3132_v59 = vld [vmem:[%s6395_s5 + $0x1a0] sm:$0xf0] }
  0x4f   :  { %v3322_v63 = vld [vmem:[%s6395_s5 + $0x300] sm:$0xf]  ;;  %v3611_v6 = vor.u32 %v4201_v61, %v3610_v60  ;;  %v3391_v60 = vor.u32 %v4141_v55, %v3388_v57 }
  0x50   :  { %v4129_v0 = vld [vmem:[%s6395_s5 + $0x31c] sm:$0xf0] }
  0x51   :  { %v3066_v2 = vld [vmem:[%s6395_s5 + $0x100] sm:$0xf]  ;;  %v3323_v10 = vor.u32 %v4129_v0, %v3322_v63  ;;  %v3356_v63 = vld [vmem:[%s6395_s5 + $0x360] sm:$0xf0] }
  0x52   :  { %v4065_v3 = vld [vmem:[%s6395_s5 + $0x11c] sm:$0xf0] }
  0x53   :  { %v3834_v5 = vld [vmem:[%s6395_s5 + $0x700] sm:$0xf]  ;;  %v3067_v13 = vor.u32 %v4065_v3, %v3066_v2  ;;  %v3324_v2 = vld [vmem:[%s6395_s5 + $0x320] sm:$0xf0] }
  0x54   :  { %v4257_v7 = vld [vmem:[%s6395_s5 + $0x71c] sm:$0xf0] }
  0x55   :  { %v3578_v8 = vld [vmem:[%s6395_s5 + $0x500] sm:$0xf] }
  0x56   :  { %v4193_v9 = vld [vmem:[%s6395_s5 + $0x51c] sm:$0xf0] }
  0x57   :  { %v3290_v11 = vld [vmem:[%s6395_s5 + $0x2c0] sm:$0xf] }
  0x58   :  { %v4121_v12 = vld [vmem:[%s6395_s5 + $0x2dc] sm:$0xf0] }
  0x59   :  { %v3258_v23 = vld [vmem:[%s6395_s5 + $0x280] sm:$0xf] }
  0x5a   :  { %v4113_v25 = vld [vmem:[%s6395_s5 + $0x29c] sm:$0xf0] }
  0x5b   :  { %v4049_v27 = vld [vmem:[%s6395_s5 + $0x9c] sm:$0xf0]  ;;  %v3259_v32 = vor.u32 %v4113_v25, %v3258_v23  ;;  %v3068_v23 = vld [vmem:[%s6395_s5 + $0x120] sm:$0xf0] }
  0x5c   :  { %v3226_v33 = vld [vmem:[%s6395_s5 + $0x240] sm:$0xf]  ;;  %v4109_v25 = vld [vmem:[%s6395_s5 + $0x284] sm:$0xf] }
  0x5d   :  { %v3738_v39 = vld [vmem:[%s6395_s5 + $0x640] sm:$0xf] }
  0x5e   :  { %v3194_v42 = vld [vmem:[%s6395_s5 + $0x200] sm:$0xf] }
  0x5f   :  { %v4097_v43 = vld [vmem:[%s6395_s5 + $0x21c] sm:$0xf0] }
  0x60   :  { %v4033_v47 = vld [vmem:[%s6395_s5 + $0x1c] sm:$0xf0]  ;;  %v3195_v52 = vor.u32 %v4097_v43, %v3194_v42  ;;  %v4261_v42 = vld [vmem:[%s6395_s5 + $0x744] sm:$0xf] }
  0x88   :  { %v78_v14 = vpop.f32.mrf.mxu0 }
  0x89   :  { %v92_v15 = vpop.f32.mrf.mxu1  ;;  %v79_v18 = vadd.f32 %v78_v14, %v36_v16  ;;  %v3034_v14 = vld [vmem:[%s6395_s5 + $0xc0] sm:$0xf] }
  0x8a   :  { %v93_v19 = vadd.f32 %v92_v15, %v37_v17  ;;  %v4057_v15 = vld [vmem:[%s6395_s5 + $0xdc] sm:$0xf0] }
  0x8b   :  { %v97_v30 = vmax.f32 %v79_v18, 0.0  ;;  %v3579_v18 = vor.u32 %v4193_v9, %v3578_v8  ;;  %v3035_v24 = vor.u32 %v4057_v15, %v3034_v14  ;;  %v3100_v8 = vld [vmem:[%s6395_s5 + $0x160] sm:$0xf0] }
  0x8c   :  { %v98_v34 = vmax.f32 %v93_v19, 0.0  ;;  %v4249_v19 = vld [vmem:[%s6395_s5 + $0x6dc] sm:$0xf0]  ;;  %v3292_v14 = vld [vmem:[%s6395_s5 + $0x2e0] sm:$0xf0] }
  0x8d   :  { %v4277_v15 = vld [vmem:[%s6395_s5 + $0x7c4] sm:$0xf] }
  0x90   :  { %v80_v20 = vpop.f32.mrf.mxu0 }
  0x91   :  { %v81_v21 = vadd.f32 %v80_v20, %v36_v16  ;;  %v94_v22 = vpop.f32.mrf.mxu1  ;;  %v3835_v16 = vor.u32 %v4257_v7, %v3834_v5  ;;  %v3546_v20 = vld [vmem:[%s6395_s5 + $0x4c0] sm:$0xf]  ;;  %v4069_v7 = vld [vmem:[%s6395_s5 + $0x144] sm:$0xf] }
  0x92   :  { %v95_v26 = vadd.f32 %v94_v22, %v37_v17  ;;  %v3802_v17 = vld [vmem:[%s6395_s5 + $0x6c0] sm:$0xf]  ;;  %v3291_v22 = vor.u32 %v4121_v12, %v3290_v11  ;;  %v3103_v9 = vor.u32 %v4069_v7, %v3100_v8  ;;  %v3580_v7 = vld [vmem:[%s6395_s5 + $0x520] sm:$0xf0] }
  0x93   :  { %v99_v31 = vmax.f32 %v81_v21, 0.0  ;;  %v4185_v21 = vld [vmem:[%s6395_s5 + $0x4dc] sm:$0xf0]  ;;  %v3803_v28 = vor.u32 %v4249_v19, %v3802_v17  ;;  %v3932_v17 = vld [vmem:[%s6395_s5 + $0x7e0] sm:$0xf0] }
  0x94   :  { %v100_v35 = vmax.f32 %v95_v26, 0.0  ;;  %v3002_v26 = vld [vmem:[%s6395_s5 + $0x80] sm:$0xf]  ;;  %v3547_v29 = vor.u32 %v4185_v21, %v3546_v20  ;;  %v3935_v20 = vor.u32 %v4277_v15, %v3932_v17  ;;  %v4229_v15 = vld [vmem:[%s6395_s5 + $0x644] sm:$0xf] }
  0x95   :  { %v4797_v36 = vpack.c.bf16 %v99_v31, %v97_v30  ;;  %v3770_v30 = vld [vmem:[%s6395_s5 + $0x680] sm:$0xf] }
  0x96   :  { %v4805_v41 = vpack.c.bf16 %v100_v35, %v98_v34  ;;  %v4241_v31 = vld [vmem:[%s6395_s5 + $0x69c] sm:$0xf0]  ;;  %v3003_v34 = vor.u32 %v4049_v27, %v3002_v26  ;;  %v3260_v26 = vld [vmem:[%s6395_s5 + $0x2a0] sm:$0xf0] }
  0x97   :  { %505 = vmatmul.bf16.vlgmr.msra.gmra.mxu2 %v4797_v36  ;;  %533 = vmatmul.bf16.vlgmr.msrb.gmra.mxu0 %v4797_v36  ;;  %v4105_v35 = vld [vmem:[%s6395_s5 + $0x25c] sm:$0xf0]  ;;  %v3771_v38 = vor.u32 %v4241_v31, %v3770_v30  ;;  %v4269_v27 = vld [vmem:[%s6395_s5 + $0x784] sm:$0xf] }
  0x98   :  { %519 = vmatmul.bf16.vlgmr.msra.gmra.mxu3 %v4805_v41  ;;  %547 = vmatmul.bf16.vlgmr.msrb.gmra.mxu1 %v4805_v41  ;;  %v4177_v5 = vld [vmem:[%s6395_s5 + $0x49c] sm:$0xf0] }
  0x99   :  { %2189 = vmatpush.bf16.msra.mxu3 %v3419_v37  ;;  %2175 = vmatpush.bf16.msra.mxu2 %v3163_v40  ;;  %v4041_v37 = vld [vmem:[%s6395_s5 + $0x5c] sm:$0xf0] }
  0x9a   :  { %2217 = vmatpush.bf16.msrb.mxu1 %v3931_v44  ;;  %2203 = vmatpush.bf16.msrb.mxu0 %v3675_v46  ;;  %v4233_v40 = vld [vmem:[%s6395_s5 + $0x65c] sm:$0xf0] }
  0x9b   :  { %v2938_v46 = vld [vmem:[%s6395_s5] sm:$0xf]  ;;  %v3739_v48 = vor.u32 %v4233_v40, %v3738_v39  ;;  %v4101_v40 = vld [vmem:[%s6395_s5 + $0x244] sm:$0xf] }
  0x9c   :  { %v4225_v11 = vld [vmem:[%s6395_s5 + $0x61c] sm:$0xf0] }
  0x9d   :  { %2190 = vmatpush.bf16.msra.mxu3 %v3387_v50  ;;  %2176 = vmatpush.bf16.msra.mxu2 %v3131_v53  ;;  %v4085_v50 = vld [vmem:[%s6395_s5 + $0x1c4] sm:$0xf]  ;;  %v2939_v53 = vor.u32 %v4033_v47, %v2938_v46  ;;  %v4169_v19 = vld [vmem:[%s6395_s5 + $0x45c] sm:$0xf0] }
  0x9e   :  { %2218 = vmatpush.bf16.msrb.mxu1 %v3899_v56  ;;  %2204 = vmatpush.bf16.msrb.mxu0 %v3643_v58  ;;  %v3167_v56 = vor.u32 %v4085_v50, %v3164_v51  ;;  %v4077_v58 = vld [vmem:[%s6395_s5 + $0x184] sm:$0xf]  ;;  %v3450_v30 = vld [vmem:[%s6395_s5 + $0x400] sm:$0xf] }
  0x9f   :  { %v3135_v61 = vor.u32 %v4077_v58, %v3132_v59  ;;  %v4161_v31 = vld [vmem:[%s6395_s5 + $0x41c] sm:$0xf0]  ;;  %v4045_v46 = vld [vmem:[%s6395_s5 + $0x84] sm:$0xf] }
  0xa0   :  { %v3004_v47 = vld [vmem:[%s6395_s5 + $0xa0] sm:$0xf0] }
  0xa1   :  { %2191 = vmatpush.bf16.msra.mxu3 %v3355_v62  ;;  %2177 = vmatpush.bf16.msra.mxu2 %v3099_v1  ;;  %v4133_v62 = vld [vmem:[%s6395_s5 + $0x344] sm:$0xf]  ;;  %v3007_v49 = vor.u32 %v4045_v46, %v3004_v47 }
  0xa2   :  { %2219 = vmatpush.bf16.msrb.mxu1 %v3867_v4  ;;  %2205 = vmatpush.bf16.msrb.mxu0 %v3611_v6  ;;  %v3359_v0 = vor.u32 %v4133_v62, %v3356_v63  ;;  %v4125_v1 = vld [vmem:[%s6395_s5 + $0x304] sm:$0xf]  ;;  %v3514_v4 = vld [vmem:[%s6395_s5 + $0x480] sm:$0xf] }
  0xa3   :  { %v3327_v3 = vor.u32 %v4125_v1, %v3324_v2  ;;  %v3515_v6 = vor.u32 %v4177_v5, %v3514_v4  ;;  %v3644_v50 = vld [vmem:[%s6395_s5 + $0x5a0] sm:$0xf0] }
  0xa4   :  { %v4037_v58 = vld [vmem:[%s6395_s5 + $0x44] sm:$0xf] }
  0xa5   :  { %2192 = vmatpush.bf16.msra.mxu3 %v3323_v10  ;;  %2178 = vmatpush.bf16.msra.mxu2 %v3067_v13  ;;  %v3706_v10 = vld [vmem:[%s6395_s5 + $0x600] sm:$0xf]  ;;  %v4117_v13 = vld [vmem:[%s6395_s5 + $0x2c4] sm:$0xf] }
  0xa6   :  { %2220 = vmatpush.bf16.msrb.mxu1 %v3835_v16  ;;  %2206 = vmatpush.bf16.msrb.mxu0 %v3579_v18  ;;  %v3707_v12 = vor.u32 %v4225_v11, %v3706_v10  ;;  %v3295_v16 = vor.u32 %v4117_v13, %v3292_v14  ;;  %v3482_v18 = vld [vmem:[%s6395_s5 + $0x440] sm:$0xf]  ;;  %v2972_v59 = vld [vmem:[%s6395_s5 + $0x60] sm:$0xf0] }
  0xa7   :  { %561 = vmatmul.bf16.vlgmr.msrb.gmra.mxu2 %v4797_v36  ;;  %589 = vmatmul.bf16.vlgmr.msra.gmra.mxu0 %v4797_v36  ;;  %v2970_v36 = vld [vmem:[%s6395_s5 + $0x40] sm:$0xf]  ;;  %v3483_v21 = vor.u32 %v4169_v19, %v3482_v18  ;;  %v3612_v62 = vld [vmem:[%s6395_s5 + $0x560] sm:$0xf0] }
  0xa8   :  { %575 = vmatmul.bf16.vlgmr.msrb.gmra.mxu3 %v4805_v41  ;;  %603 = vmatmul.bf16.vlgmr.msra.gmra.mxu1 %v4805_v41  ;;  %v3227_v41 = vor.u32 %v4105_v35, %v3226_v33  ;;  %v2971_v44 = vor.u32 %v4041_v37, %v2970_v36  ;;  %v3451_v33 = vor.u32 %v4161_v31, %v3450_v30  ;;  %v3036_v35 = vld [vmem:[%s6395_s5 + $0xe0] sm:$0xf0] }
  0xa9   :  { %2193 = vmatpush.bf16.msra.mxu3 %v3291_v22  ;;  %2179 = vmatpush.bf16.msra.mxu2 %v3035_v24  ;;  %v4061_v22 = vld [vmem:[%s6395_s5 + $0x104] sm:$0xf] }
  0xaa   :  { %2221 = vmatpush.bf16.msrb.mxu1 %v3803_v28  ;;  %2207 = vmatpush.bf16.msrb.mxu0 %v3547_v29  ;;  %v3071_v24 = vor.u32 %v4061_v22, %v3068_v23  ;;  %v3263_v28 = vor.u32 %v4109_v25, %v3260_v26  ;;  %v3900_v29 = vld [vmem:[%s6395_s5 + $0x7a0] sm:$0xf0] }
  0xab   :  { %v4213_v36 = vld [vmem:[%s6395_s5 + $0x5c4] sm:$0xf] }
  0xac   :  { %v3804_v1 = vld [vmem:[%s6395_s5 + $0x6e0] sm:$0xf0] }
  0xad   :  { %2194 = vmatpush.bf16.msra.mxu3 %v3259_v32  ;;  %2180 = vmatpush.bf16.msra.mxu2 %v3003_v34  ;;  %v3903_v32 = vor.u32 %v4269_v27, %v3900_v29  ;;  %v4053_v34 = vld [vmem:[%s6395_s5 + $0xc4] sm:$0xf] }
  0xae   :  { %2222 = vmatpush.bf16.msrb.mxu1 %v3771_v38  ;;  %2208 = vmatpush.bf16.msrb.mxu0 %v3515_v6  ;;  %v3039_v37 = vor.u32 %v4053_v34, %v3036_v35  ;;  %v3676_v38 = vld [vmem:[%s6395_s5 + $0x5e0] sm:$0xf0] }
  0xaf   :  { %v3679_v39 = vor.u32 %v4213_v36, %v3676_v38  ;;  %v2940_v4 = vld [vmem:[%s6395_s5 + $0x20] sm:$0xf0] }
  0xb0   :  { %v4189_v5 = vld [vmem:[%s6395_s5 + $0x504] sm:$0xf] }
  0xb1   :  { %2195 = vmatpush.bf16.msra.mxu3 %v3227_v41  ;;  %2181 = vmatpush.bf16.msra.mxu2 %v2971_v44  ;;  %v3228_v41 = vld [vmem:[%s6395_s5 + $0x260] sm:$0xf0]  ;;  %v3583_v8 = vor.u32 %v4189_v5, %v3580_v7  ;;  %v4082_v7 = vld [vmem:[%s6395_s5 + $0x1a4] sm:$0xf0] }
  0xb2   :  { %2223 = vmatpush.bf16.msrb.mxu1 %v3739_v48  ;;  %2209 = vmatpush.bf16.msrb.mxu0 %v3483_v21  ;;  %v3231_v43 = vor.u32 %v4101_v40, %v3228_v41  ;;  %v3868_v44 = vld [vmem:[%s6395_s5 + $0x760] sm:$0xf0]  ;;  %v5154_v21 = vld [vmem:[%s6394_s4] sm:$0xf] }
  0xb3   :  { %v3871_v45 = vor.u32 %v4261_v42, %v3868_v44  ;;  %v4205_v48 = vld [vmem:[%s6395_s5 + $0x584] sm:$0xf]  ;;  %v169_v36 = vperm.slane %v5154_v21, 0  ;;  %v3426_v44 = vld [vmem:[%s6395_s5 + $0x3c8] sm:$0xf] }
  0xb4   :  { %v3647_v51 = vor.u32 %v4205_v48, %v3644_v50  ;;  %v3772_v10 = vld [vmem:[%s6395_s5 + $0x6a0] sm:$0xf0] }
  0xb5   :  { %2196 = vmatpush.bf16.msra.mxu3 %v3195_v52  ;;  %2182 = vmatpush.bf16.msra.mxu2 %v2939_v53  ;;  %v4093_v52 = vld [vmem:[%s6395_s5 + $0x204] sm:$0xf] }
  0xb6   :  { %2224 = vmatpush.bf16.msrb.mxu1 %v3707_v12  ;;  %2210 = vmatpush.bf16.msrb.mxu0 %v3451_v33  ;;  %v3196_v53 = vld [vmem:[%s6395_s5 + $0x220] sm:$0xf0] }
  0xb7   :  { %v3199_v55 = vor.u32 %v4093_v52, %v3196_v53  ;;  %v4181_v12 = vld [vmem:[%s6395_s5 + $0x4c4] sm:$0xf] }
  0xb8   :  { %v3548_v13 = vld [vmem:[%s6395_s5 + $0x4e0] sm:$0xf0] }
  0xb9   :  { %2245 = vmatpush.bf16.msrb.mxu3 %v3423_v54  ;;  %2231 = vmatpush.bf16.msrb.mxu2 %v3167_v56  ;;  %v4253_v54 = vld [vmem:[%s6395_s5 + $0x704] sm:$0xf]  ;;  %v3551_v14 = vor.u32 %v4181_v12, %v3548_v13  ;;  %v3330_v12 = vld [vmem:[%s6395_s5 + $0x308] sm:$0xf] }
  0xba   :  { %2273 = vmatpush.bf16.msra.mxu1 %v3935_v20  ;;  %2259 = vmatpush.bf16.msra.mxu0 %v3679_v39  ;;  %v3836_v56 = vld [vmem:[%s6395_s5 + $0x720] sm:$0xf0]  ;;  %v4130_v13 = vld [vmem:[%s6395_s5 + $0x324] sm:$0xf0] }
  0xbb   :  { %v3839_v57 = vor.u32 %v4253_v54, %v3836_v56  ;;  %v4173_v18 = vld [vmem:[%s6395_s5 + $0x484] sm:$0xf]  ;;  %v3394_v54 = vld [vmem:[%s6395_s5 + $0x388] sm:$0xf] }
  0xbc   :  { %v3516_v19 = vld [vmem:[%s6395_s5 + $0x4a0] sm:$0xf0] }
  0xbd   :  { %2246 = vmatpush.bf16.msrb.mxu3 %v3391_v60  ;;  %2232 = vmatpush.bf16.msrb.mxu2 %v3135_v61  ;;  %v2975_v60 = vor.u32 %v4037_v58, %v2972_v59  ;;  %v4197_v61 = vld [vmem:[%s6395_s5 + $0x544] sm:$0xf]  ;;  %v3519_v20 = vor.u32 %v4173_v18, %v3516_v19  ;;  %v172_v58 = vperm.slane %v5154_v21, 3  ;;  %v3106_v18 = vld [vmem:[%s6395_s5 + $0x148] sm:$0xf] }
  0xbe   :  { %2274 = vmatpush.bf16.msra.mxu1 %v3903_v32  ;;  %2260 = vmatpush.bf16.msra.mxu0 %v3647_v51  ;;  %v3615_v63 = vor.u32 %v4197_v61, %v3612_v62  ;;  %v4221_v22 = vld [vmem:[%s6395_s5 + $0x604] sm:$0xf]  ;;  %v4090_v61 = vld [vmem:[%s6395_s5 + $0x1e4] sm:$0xf0] }
  0xbf   :  { %v3708_v23 = vld [vmem:[%s6395_s5 + $0x620] sm:$0xf0]  ;;  %v4074_v19 = vld [vmem:[%s6395_s5 + $0x164] sm:$0xf0] }
  0xc0   :  { %v4165_v26 = vld [vmem:[%s6395_s5 + $0x444] sm:$0xf] }
  0xc1   :  { %2247 = vmatpush.bf16.msrb.mxu3 %v3359_v0  ;;  %2233 = vmatpush.bf16.msrb.mxu2 %v3103_v9  ;;  %v4245_v0 = vld [vmem:[%s6395_s5 + $0x6c4] sm:$0xf] }
  0xc2   :  { %2275 = vmatpush.bf16.msra.mxu1 %v3871_v45  ;;  %v3807_v2 = vor.u32 %v4245_v0, %v3804_v1  ;;  %2261 = vmatpush.bf16.msra.mxu0 %v3615_v63  ;;  %v4237_v9 = vld [vmem:[%s6395_s5 + $0x684] sm:$0xf]  ;;  %v4154_v45 = vld [vmem:[%s6395_s5 + $0x3e4] sm:$0xf0] }
  0xc3   :  { %v3775_v11 = vor.u32 %v4237_v9, %v3772_v10  ;;  %v3484_v27 = vld [vmem:[%s6395_s5 + $0x460] sm:$0xf0]  ;;  %v3362_v1 = vld [vmem:[%s6395_s5 + $0x348] sm:$0xf]  ;;  %v171_v10 = vperm.slane %v5154_v21, 2 }
  0xc4   :  { %v3487_v30 = vor.u32 %v4165_v26, %v3484_v27  ;;  %v4157_v31 = vld [vmem:[%s6395_s5 + $0x404] sm:$0xf]  ;;  %v3938_v26 = vld [vmem:[%s6395_s5 + $0x7c8] sm:$0xf] }
  0xc5   :  { %2248 = vmatpush.bf16.msrb.mxu3 %v3327_v3  ;;  %2234 = vmatpush.bf16.msrb.mxu2 %v3071_v24  ;;  %v4029_v3 = vld [vmem:[%s6395_s5 + $0x4] sm:$0xf]  ;;  %v3711_v24 = vor.u32 %v4221_v22, %v3708_v23  ;;  %v3298_v22 = vld [vmem:[%s6395_s5 + $0x2c8] sm:$0xf] }
  0xc6   :  { %2276 = vmatpush.bf16.msra.mxu1 %v3839_v57  ;;  %v2943_v6 = vor.u32 %v4029_v3, %v2940_v4  ;;  %2262 = vmatpush.bf16.msra.mxu0 %v3583_v8  ;;  %v3452_v32 = vld [vmem:[%s6395_s5 + $0x420] sm:$0xf0]  ;;  %v4282_v27 = vld [vmem:[%s6395_s5 + $0x7e4] sm:$0xf0] }
  0xc7   :  { %v3455_v34 = vor.u32 %v4157_v31, %v3452_v32  ;;  %v3074_v31 = vld [vmem:[%s6395_s5 + $0x108] sm:$0xf] }
  0xc8   :  { %v4066_v32 = vld [vmem:[%s6395_s5 + $0x124] sm:$0xf0] }
  0xc9   :  { %2249 = vmatpush.bf16.msrb.mxu3 %v3295_v16  ;;  %2235 = vmatpush.bf16.msrb.mxu2 %v3039_v37  ;;  %v3740_v16 = vld [vmem:[%s6395_s5 + $0x660] sm:$0xf0] }
  0xca   :  { %2277 = vmatpush.bf16.msra.mxu1 %v3807_v2  ;;  %v3743_v17 = vor.u32 %v4229_v15, %v3740_v16  ;;  %2263 = vmatpush.bf16.msra.mxu0 %v3551_v14  ;;  %v4138_v2 = vld [vmem:[%s6395_s5 + $0x364] sm:$0xf0] }
  0xcb   :  { %v3363_v9 = vor.u32 %v4138_v2, %v3362_v1  ;;  %v4210_v1 = vld [vmem:[%s6395_s5 + $0x5a4] sm:$0xf0] }
  0xcd   :  { %2250 = vmatpush.bf16.msrb.mxu3 %v3263_v28  ;;  %2236 = vmatpush.bf16.msrb.mxu2 %v3007_v49  ;;  %v170_v28 = vperm.slane %v5154_v21, 1  ;;  %v3427_v49 = vor.u32 %v4154_v45, %v3426_v44  ;;  %v3331_v21 = vor.u32 %v4130_v13, %v3330_v12  ;;  %v3075_v44 = vor.u32 %v4066_v32, %v3074_v31  ;;  %v3042_v45 = vld [vmem:[%s6395_s5 + $0xc8] sm:$0xf]  ;;  %v3428_v12 = vld [vmem:[%s6395_s5 + $0x3e8] sm:$0xf0] }
  0xce   :  { %2278 = vmatpush.bf16.msra.mxu1 %v3775_v11  ;;  %2264 = vmatpush.bf16.msra.mxu0 %v3519_v20  ;;  %v2978_v13 = vld [vmem:[%s6395_s5 + $0x48] sm:$0xf]  ;;  %v4086_v31 = vld [vmem:[%s6395_s5 + $0x1cc] sm:$0xf] }
  0xcf   :  { %v3172_v32 = vld [vmem:[%s6395_s5 + $0x1e8] sm:$0xf0] }
  0xd1   :  { %2251 = vmatpush.bf16.msrb.mxu3 %v3231_v43  ;;  %2237 = vmatpush.bf16.msrb.mxu2 %v2975_v60  ;;  %v3170_v60 = vld [vmem:[%s6395_s5 + $0x1c8] sm:$0xf] }
  0xd2   :  { %2279 = vmatpush.bf16.msra.mxu1 %v3743_v17  ;;  %2265 = vmatpush.bf16.msra.mxu0 %v3487_v30  ;;  %v3171_v3 = vor.u32 %v4090_v61, %v3170_v60  ;;  %v3010_v61 = vld [vmem:[%s6395_s5 + $0x88] sm:$0xf] }
  0xd5   :  { %2252 = vmatpush.bf16.msrb.mxu3 %v3199_v55  ;;  %2238 = vmatpush.bf16.msrb.mxu2 %v2943_v6  ;;  %v4146_v55 = vld [vmem:[%s6395_s5 + $0x3a4] sm:$0xf0] }
  0xd6   :  { %2280 = vmatpush.bf16.msra.mxu1 %v3711_v24  ;;  %2266 = vmatpush.bf16.msra.mxu0 %v3455_v34  ;;  %v3395_v62 = vor.u32 %v4146_v55, %v3394_v54  ;;  %v3138_v6 = vld [vmem:[%s6395_s5 + $0x188] sm:$0xf] }
  0xd7   :  { %v3139_v15 = vor.u32 %v4082_v7, %v3138_v6  ;;  %v4106_v54 = vld [vmem:[%s6395_s5 + $0x264] sm:$0xf0] }
  0xd8   :  { %v4098_v6 = vld [vmem:[%s6395_s5 + $0x224] sm:$0xf0] }
  0xd9   :  { %v3842_v7 = vld [vmem:[%s6395_s5 + $0x708] sm:$0xf] }
 0x114   :  { %v534_v25 = vpop.f32.mrf.mxu0 }
 0x115   :  { %v548_v29 = vpop.f32.mrf.mxu1  ;;  %v535_v33 = vadd.f32 %v534_v25, %v170_v28  ;;  %v4122_v25 = vld [vmem:[%s6395_s5 + $0x2e4] sm:$0xf0] }
 0x116   :  { %v3299_v34 = vor.u32 %v4122_v25, %v3298_v22  ;;  %v3396_v25 = vld [vmem:[%s6395_s5 + $0x3a8] sm:$0xf0] }
 0x117   :  { %v549_v39 = vadd.f32 %v548_v29, %v535_v33 }
 0x119   :  { %v610_v46 = vmax.f32 %v549_v39, 0.0 }
 0x11a   :  { %v506_v35 = vpop.f32.mrf.mxu2 }
 0x11b   :  { %v520_v37 = vpop.f32.mrf.mxu3  ;;  %v507_v42 = vadd.f32 %v506_v35, %v169_v36  ;;  %v3939_v35 = vor.u32 %v4282_v27, %v3938_v26  ;;  %v2946_v26 = vld [vmem:[%s6395_s5 + $0x8] sm:$0xf] }
 0x11c   :  { %v536_v38 = vpop.f32.mrf.mxu0  ;;  %v4034_v27 = vld [vmem:[%s6395_s5 + $0x24] sm:$0xf0] }
 0x11d   :  { %v537_v40 = vadd.f32 %v536_v38, %v170_v28  ;;  %v550_v41 = vpop.f32.mrf.mxu1  ;;  %v521_v50 = vadd.f32 %v520_v37, %v507_v42  ;;  %v3107_v28 = vor.u32 %v4074_v19, %v3106_v18  ;;  %v4274_v42 = vld [vmem:[%s6395_s5 + $0x7a4] sm:$0xf0] }
 0x11f   :  { %v551_v43 = vadd.f32 %v550_v41, %v537_v40  ;;  %v609_v63 = vmax.f32 %v521_v50, 0.0  ;;  %v4114_v40 = vld [vmem:[%s6395_s5 + $0x2a4] sm:$0xf0] }
 0x120   :  { %v3906_v41 = vld [vmem:[%s6395_s5 + $0x788] sm:$0xf] }
 0x121   :  { %v614_v47 = vmax.f32 %v551_v43, 0.0 }
 0x122   :  { %v508_v48 = vpop.f32.mrf.mxu2 }
 0x123   :  { %v5182_v51 = vpack.c.bf16 %v614_v47, %v610_v46  ;;  %v509_v52 = vadd.f32 %v508_v48, %v169_v36  ;;  %v522_v53 = vpop.f32.mrf.mxu3  ;;  %v3266_v36 = vld [vmem:[%s6395_s5 + $0x288] sm:$0xf] }
 0x124   :  { %v590_v56 = vpop.f32.mrf.mxu0  ;;  %v4058_v47 = vld [vmem:[%s6395_s5 + $0xe4] sm:$0xf0]  ;;  %v3267_v50 = vor.u32 %v4114_v40, %v3266_v36  ;;  %v2947_v36 = vor.u32 %v4034_v27, %v2946_v26  ;;  %v3364_v40 = vld [vmem:[%s6395_s5 + $0x368] sm:$0xf0] }
 0x125   :  { %v523_v57 = vadd.f32 %v522_v53, %v509_v52  ;;  %v604_v59 = vpop.f32.mrf.mxu1  ;;  %2197 = vmatmul.bf16.vlgmr.msra.gmra.mxu3 %v5182_v51  ;;  %v591_v5 = vadd.f32 %v590_v56, %v172_v58  ;;  %v3682_v48 = vld [vmem:[%s6395_s5 + $0x5c8] sm:$0xf]  ;;  %v3907_v52 = vor.u32 %v4274_v42, %v3906_v41  ;;  %v3175_v41 = vor.u32 %v4086_v31, %v3172_v32  ;;  %v4262_v31 = vld [vmem:[%s6395_s5 + $0x74c] sm:$0xf] }
 0x126   :  { %2301 = vmatpush.bf16.msra.mxu3 %v3427_v49  ;;  %v4218_v49 = vld [vmem:[%s6395_s5 + $0x5e4] sm:$0xf0]  ;;  %v3876_v32 = vld [vmem:[%s6395_s5 + $0x768] sm:$0xf0] }
 0x127   :  { %v613_v0 = vmax.f32 %v523_v57, 0.0  ;;  %v605_v16 = vadd.f32 %v604_v59, %v591_v5  ;;  %v3234_v53 = vld [vmem:[%s6395_s5 + $0x248] sm:$0xf]  ;;  %v3043_v59 = vor.u32 %v4058_v47, %v3042_v45  ;;  %v3683_v60 = vor.u32 %v4218_v49, %v3682_v48  ;;  %v4078_v45 = vld [vmem:[%s6395_s5 + $0x18c] sm:$0xf] }
 0x128   :  { %v3874_v57 = vld [vmem:[%s6395_s5 + $0x748] sm:$0xf]  ;;  %v3235_v2 = vor.u32 %v4106_v54, %v3234_v53  ;;  %v3332_v53 = vld [vmem:[%s6395_s5 + $0x328] sm:$0xf0] }
 0x129   :  { %v5204_v4 = vpack.c.bf16 %v613_v0, %v609_v63  ;;  %v612_v29 = vmax.f32 %v605_v16, 0.0  ;;  %v4050_v63 = vld [vmem:[%s6395_s5 + $0xa4] sm:$0xf0] }
 0x12a   :  { %2302 = vmatpush.bf16.msra.mxu3 %v3395_v62  ;;  %v562_v8 = vpop.f32.mrf.mxu2  ;;  %v3650_v0 = vld [vmem:[%s6395_s5 + $0x588] sm:$0xf] }
 0x12b   :  { %v576_v11 = vpop.f32.mrf.mxu3  ;;  %2183 = vmatmul.bf16.vlgmr.msra.gmra.mxu2 %v5204_v4  ;;  %v563_v23 = vadd.f32 %v562_v8, %v171_v10  ;;  %v3202_v5 = vld [vmem:[%s6395_s5 + $0x208] sm:$0xf] }
 0x12c   :  { %2287 = vmatpush.bf16.msra.mxu2 %v3171_v3  ;;  %v592_v14 = vpop.f32.mrf.mxu0  ;;  %v4258_v8 = vld [vmem:[%s6395_s5 + $0x724] sm:$0xf0] }
 0x12d   :  { %v593_v17 = vadd.f32 %v592_v14, %v172_v58  ;;  %v606_v20 = vpop.f32.mrf.mxu1  ;;  %v577_v37 = vadd.f32 %v576_v11, %v563_v23  ;;  %v4266_v58 = vld [vmem:[%s6395_s5 + $0x764] sm:$0xf0]  ;;  %v4150_v11 = vld [vmem:[%s6395_s5 + $0x3cc] sm:$0xf]  ;;  %v3843_v18 = vor.u32 %v4258_v8, %v3842_v7 }
 0x12e   :  { %2303 = vmatpush.bf16.msra.mxu3 %v3363_v9  ;;  %v3875_v3 = vor.u32 %v4266_v58, %v3874_v57  ;;  %v3011_v9 = vor.u32 %v4050_v63, %v3010_v61  ;;  %v4042_v14 = vld [vmem:[%s6395_s5 + $0x64] sm:$0xf0]  ;;  %v3431_v19 = vor.u32 %v4150_v11, %v3428_v12  ;;  %v4070_v58 = vld [vmem:[%s6395_s5 + $0x14c] sm:$0xf] }
 0x12f   :  { %v607_v24 = vadd.f32 %v606_v20, %v593_v17  ;;  %v611_v55 = vmax.f32 %v577_v37, 0.0  ;;  %v4202_v16 = vld [vmem:[%s6395_s5 + $0x564] sm:$0xf0]  ;;  %v3203_v17 = vor.u32 %v4098_v6, %v3202_v5  ;;  %v2979_v22 = vor.u32 %v4042_v14, %v2978_v13  ;;  %v3940_v5 = vld [vmem:[%s6395_s5 + $0x7e8] sm:$0xf0] }
 0x130   :  { %2288 = vmatpush.bf16.msra.mxu2 %v3139_v15  ;;  %v3618_v15 = vld [vmem:[%s6395_s5 + $0x548] sm:$0xf]  ;;  %v3076_v11 = vld [vmem:[%s6395_s5 + $0x128] sm:$0xf0] }
 0x131   :  { %v616_v30 = vmax.f32 %v607_v24, 0.0  ;;  %v3810_v20 = vld [vmem:[%s6395_s5 + $0x6c8] sm:$0xf]  ;;  %v3619_v23 = vor.u32 %v4202_v16, %v3618_v15  ;;  %v4142_v24 = vld [vmem:[%s6395_s5 + $0x38c] sm:$0xf] }
 0x132   :  { %2304 = vmatpush.bf16.msra.mxu3 %v3331_v21  ;;  %v564_v33 = vpop.f32.mrf.mxu2  ;;  %v4250_v21 = vld [vmem:[%s6395_s5 + $0x6e4] sm:$0xf0]  ;;  %v4110_v14 = vld [vmem:[%s6395_s5 + $0x28c] sm:$0xf] }
 0x133   :  { %v5247_v38 = vpack.c.bf16 %v616_v30, %v612_v29  ;;  %v565_v39 = vadd.f32 %v564_v33, %v171_v10  ;;  %v578_v43 = vpop.f32.mrf.mxu3  ;;  %v3651_v10 = vor.u32 %v4210_v1, %v3650_v0  ;;  %v4194_v29 = vld [vmem:[%s6395_s5 + $0x524] sm:$0xf0]  ;;  %v3811_v30 = vor.u32 %v4250_v21, %v3810_v20  ;;  %v4118_v0 = vld [vmem:[%s6395_s5 + $0x2cc] sm:$0xf] }
 0x134   :  { %2289 = vmatpush.bf16.msra.mxu2 %v3107_v28  ;;  %v3586_v28 = vld [vmem:[%s6395_s5 + $0x508] sm:$0xf]  ;;  %v3399_v33 = vor.u32 %v4142_v24, %v3396_v25  ;;  %v3268_v16 = vld [vmem:[%s6395_s5 + $0x2a8] sm:$0xf0] }
 0x135   :  { %v579_v46 = vadd.f32 %v578_v43, %v565_v39  ;;  %2225 = vmatmul.bf16.vlgmr.msrb.gmra.mxu1 %v5247_v38  ;;  %2253 = vmatmul.bf16.vlgmr.msrb.gmra.mxu3 %v5182_v51  ;;  %v3587_v37 = vor.u32 %v4194_v29, %v3586_v28  ;;  %v4134_v39 = vld [vmem:[%s6395_s5 + $0x34c] sm:$0xf]  ;;  %v3554_v42 = vld [vmem:[%s6395_s5 + $0x4c8] sm:$0xf]  ;;  %v3271_v26 = vor.u32 %v4110_v14, %v3268_v16  ;;  %v3370_v14 = vld [vmem:[%s6395_s5 + $0x350] sm:$0xf] }
 0x136   :  { %2305 = vmatpush.bf16.msra.mxu3 %v3299_v34  ;;  %2329 = vmatpush.bf16.msrb.mxu1 %v3939_v35  ;;  %v3778_v34 = vld [vmem:[%s6395_s5 + $0x688] sm:$0xf]  ;;  %v3367_v47 = vor.u32 %v4134_v39, %v3364_v40  ;;  %v4214_v24 = vld [vmem:[%s6395_s5 + $0x5cc] sm:$0xf] }
 0x137   :  { %v615_v56 = vmax.f32 %v579_v46, 0.0  ;;  %v4242_v35 = vld [vmem:[%s6395_s5 + $0x6a4] sm:$0xf0]  ;;  %v3140_v46 = vld [vmem:[%s6395_s5 + $0x1a8] sm:$0xf0] }
 0x138   :  { %2290 = vmatpush.bf16.msra.mxu2 %v3075_v44  ;;  %v4186_v43 = vld [vmem:[%s6395_s5 + $0x4e4] sm:$0xf0]  ;;  %v3779_v44 = vor.u32 %v4242_v35, %v3778_v34  ;;  %v3143_v54 = vor.u32 %v4078_v45, %v3140_v46  ;;  %v3684_v25 = vld [vmem:[%s6395_s5 + $0x5e8] sm:$0xf0] }
 0x139   :  { %v5287_v62 = vpack.c.bf16 %v615_v56, %v611_v55  ;;  %v3746_v48 = vld [vmem:[%s6395_s5 + $0x648] sm:$0xf]  ;;  %v4102_v28 = vld [vmem:[%s6395_s5 + $0x24c] sm:$0xf]  ;;  %v3687_v34 = vor.u32 %v4214_v24, %v3684_v25 }
 0x13a   :  { %2306 = vmatpush.bf16.msra.mxu3 %v3267_v50  ;;  %2330 = vmatpush.bf16.msrb.mxu1 %v3907_v52  ;;  %v4234_v49 = vld [vmem:[%s6395_s5 + $0x664] sm:$0xf0]  ;;  %v3555_v50 = vor.u32 %v4186_v43, %v3554_v42  ;;  %v4126_v52 = vld [vmem:[%s6395_s5 + $0x30c] sm:$0xf] }
 0x13b   :  { %2211 = vmatmul.bf16.vlgmr.msrb.gmra.mxu0 %v5287_v62  ;;  %2239 = vmatmul.bf16.vlgmr.msrb.gmra.mxu2 %v5204_v4  ;;  %v3522_v55 = vld [vmem:[%s6395_s5 + $0x488] sm:$0xf]  ;;  %v3747_v57 = vor.u32 %v4234_v49, %v3746_v48  ;;  %v4046_v35 = vld [vmem:[%s6395_s5 + $0x8c] sm:$0xf]  ;;  %v3434_v48 = vld [vmem:[%s6395_s5 + $0x3d0] sm:$0xf] }
 0x13c   :  { %2291 = vmatpush.bf16.msra.mxu2 %v3043_v59  ;;  %2315 = vmatpush.bf16.msrb.mxu0 %v3683_v60  ;;  %v4178_v56 = vld [vmem:[%s6395_s5 + $0x4a4] sm:$0xf0]  ;;  %v3108_v59 = vld [vmem:[%s6395_s5 + $0x168] sm:$0xf0]  ;;  %v3335_v60 = vor.u32 %v4126_v52, %v3332_v53  ;;  %v4155_v49 = vld [vmem:[%s6395_s5 + $0x3ec] sm:$0xf0] }
 0x13d   :  { %v3714_v61 = vld [vmem:[%s6395_s5 + $0x608] sm:$0xf]  ;;  %v3523_v1 = vor.u32 %v4178_v56, %v3522_v55  ;;  %v3111_v6 = vor.u32 %v4070_v58, %v3108_v59  ;;  %v3652_v39 = vld [vmem:[%s6395_s5 + $0x5a8] sm:$0xf0] }
 0x13e   :  { %2307 = vmatpush.bf16.msra.mxu3 %v3235_v2  ;;  %2331 = vmatpush.bf16.msrb.mxu1 %v3875_v3  ;;  %v4226_v63 = vld [vmem:[%s6395_s5 + $0x624] sm:$0xf0]  ;;  %v3300_v2 = vld [vmem:[%s6395_s5 + $0x2e8] sm:$0xf0] }
 0x13f   :  { %v4278_v3 = vld [vmem:[%s6395_s5 + $0x7cc] sm:$0xf]  ;;  %v3490_v7 = vld [vmem:[%s6395_s5 + $0x448] sm:$0xf]  ;;  %v3303_v12 = vor.u32 %v4118_v0, %v3300_v2  ;;  %v4147_v0 = vld [vmem:[%s6395_s5 + $0x3ac] sm:$0xf0] }
 0x140   :  { %2292 = vmatpush.bf16.msra.mxu2 %v3011_v9  ;;  %2316 = vmatpush.bf16.msrb.mxu0 %v3651_v10  ;;  %v4170_v8 = vld [vmem:[%s6395_s5 + $0x464] sm:$0xf0]  ;;  %v3715_v9 = vor.u32 %v4226_v63, %v3714_v61  ;;  %v4062_v10 = vld [vmem:[%s6395_s5 + $0x10c] sm:$0xf]  ;;  %v3943_v13 = vor.u32 %v4278_v3, %v3940_v5  ;;  %v3402_v63 = vld [vmem:[%s6395_s5 + $0x390] sm:$0xf] }
 0x141   :  { %v3491_v15 = vor.u32 %v4170_v8, %v3490_v7  ;;  %v3458_v20 = vld [vmem:[%s6395_s5 + $0x408] sm:$0xf]  ;;  %v4094_v42 = vld [vmem:[%s6395_s5 + $0x20c] sm:$0xf]  ;;  %v3178_v7 = vld [vmem:[%s6395_s5 + $0x1d0] sm:$0xf] }
 0x142   :  { %2308 = vmatpush.bf16.msra.mxu3 %v3203_v17  ;;  %2332 = vmatpush.bf16.msrb.mxu1 %v3843_v18  ;;  %v4270_v17 = vld [vmem:[%s6395_s5 + $0x78c] sm:$0xf]  ;;  %v4162_v21 = vld [vmem:[%s6395_s5 + $0x424] sm:$0xf0]  ;;  %v4091_v8 = vld [vmem:[%s6395_s5 + $0x1ec] sm:$0xf0] }
 0x143   :  { %v3908_v18 = vld [vmem:[%s6395_s5 + $0x7a8] sm:$0xf0]  ;;  %v3459_v29 = vor.u32 %v4162_v21, %v3458_v20  ;;  %v3179_v16 = vor.u32 %v4091_v8, %v3178_v7  ;;  %v3146_v20 = vld [vmem:[%s6395_s5 + $0x190] sm:$0xf] }
 0x144   :  { %2293 = vmatpush.bf16.msra.mxu2 %v2979_v22  ;;  %2317 = vmatpush.bf16.msrb.mxu0 %v3619_v23  ;;  %v4054_v22 = vld [vmem:[%s6395_s5 + $0xcc] sm:$0xf]  ;;  %v3911_v27 = vor.u32 %v4270_v17, %v3908_v18  ;;  %v4083_v21 = vld [vmem:[%s6395_s5 + $0x1ac] sm:$0xf0] }
 0x145   :  { %2281 = vmatmul.bf16.vlgmr.msra.gmra.mxu1 %v5247_v38  ;;  %2309 = vmatmul.bf16.vlgmr.msra.gmra.mxu3 %v5182_v51  ;;  %v3044_v23 = vld [vmem:[%s6395_s5 + $0xe8] sm:$0xf0] }
 0x146   :  { %2357 = vmatpush.bf16.msrb.mxu3 %v3431_v19  ;;  %2333 = vmatpush.bf16.msrb.mxu1 %v3811_v30  ;;  %v3079_v19 = vor.u32 %v4062_v10, %v3076_v11  ;;  %v3236_v30 = vld [vmem:[%s6395_s5 + $0x268] sm:$0xf0] }
 0x147   :  { %v3239_v40 = vor.u32 %v4102_v28, %v3236_v30  ;;  %v3204_v43 = vld [vmem:[%s6395_s5 + $0x228] sm:$0xf0]  ;;  %v3147_v28 = vor.u32 %v4083_v21, %v3146_v20  ;;  %v4259_v20 = vld [vmem:[%s6395_s5 + $0x72c] sm:$0xf0] }
 0x148   :  { %2294 = vmatpush.bf16.msra.mxu2 %v2947_v36  ;;  %2318 = vmatpush.bf16.msrb.mxu0 %v3587_v37  ;;  %v3012_v36 = vld [vmem:[%s6395_s5 + $0xa8] sm:$0xf0]  ;;  %v3207_v55 = vor.u32 %v4094_v42, %v3204_v43  ;;  %v4283_v42 = vld [vmem:[%s6395_s5 + $0x7ec] sm:$0xf0] }
 0x149   :  { %v4206_v37 = vld [vmem:[%s6395_s5 + $0x58c] sm:$0xf]  ;;  %v3015_v46 = vor.u32 %v4046_v35, %v3012_v36 }
 0x14a   :  { %2358 = vmatpush.bf16.msrb.mxu3 %v3399_v33  ;;  %2334 = vmatpush.bf16.msrb.mxu1 %v3779_v44  ;;  %v3047_v33 = vor.u32 %v4054_v22, %v3044_v23  ;;  %v4254_v44 = vld [vmem:[%s6395_s5 + $0x70c] sm:$0xf] }
 0x14b   :  { %2267 = vmatmul.bf16.vlgmr.msra.gmra.mxu0 %v5287_v62  ;;  %2295 = vmatmul.bf16.vlgmr.msra.gmra.mxu2 %v5204_v4  ;;  %v3844_v45 = vld [vmem:[%s6395_s5 + $0x728] sm:$0xf0] }
 0x14c   :  { %2343 = vmatpush.bf16.msrb.mxu2 %v3175_v41  ;;  %2319 = vmatpush.bf16.msrb.mxu0 %v3555_v50  ;;  %v3879_v41 = vor.u32 %v4262_v31, %v3876_v32  ;;  %v4038_v50 = vld [vmem:[%s6395_s5 + $0x4c] sm:$0xf]  ;;  %v3847_v56 = vor.u32 %v4254_v44, %v3844_v45  ;;  %v3114_v32 = vld [vmem:[%s6395_s5 + $0x150] sm:$0xf] }
 0x14d   :  { %v2980_v52 = vld [vmem:[%s6395_s5 + $0x68] sm:$0xf0] }
 0x14e   :  { %2359 = vmatpush.bf16.msrb.mxu3 %v3367_v47  ;;  %2335 = vmatpush.bf16.msrb.mxu1 %v3747_v57  ;;  %v3655_v47 = vor.u32 %v4206_v37, %v3652_v39  ;;  %v4198_v53 = vld [vmem:[%s6395_s5 + $0x54c] sm:$0xf]  ;;  %v3435_v57 = vor.u32 %v4155_v49, %v3434_v48  ;;  %v3306_v37 = vld [vmem:[%s6395_s5 + $0x2d0] sm:$0xf] }
 0x14f   :  { %v4246_v58 = vld [vmem:[%s6395_s5 + $0x6cc] sm:$0xf]  ;;  %v4067_v48 = vld [vmem:[%s6395_s5 + $0x12c] sm:$0xf0] }
 0x150   :  { %2344 = vmatpush.bf16.msrb.mxu2 %v3143_v54  ;;  %2320 = vmatpush.bf16.msrb.mxu0 %v3523_v1  ;;  %v3620_v54 = vld [vmem:[%s6395_s5 + $0x568] sm:$0xf0] }
 0x151   :  { %v3812_v59 = vld [vmem:[%s6395_s5 + $0x6e8] sm:$0xf0]  ;;  %v3623_v61 = vor.u32 %v4198_v53, %v3620_v54  ;;  %v4115_v54 = vld [vmem:[%s6395_s5 + $0x2ac] sm:$0xf0] }
 0x152   :  { %2360 = vmatpush.bf16.msrb.mxu3 %v3335_v60  ;;  %2336 = vmatpush.bf16.msrb.mxu1 %v3715_v9  ;;  %v2983_v60 = vor.u32 %v4038_v50, %v2980_v52  ;;  %v4030_v1 = vld [vmem:[%s6395_s5 + $0xc] sm:$0xf]  ;;  %v3403_v9 = vor.u32 %v4147_v0, %v3402_v63  ;;  %v3274_v52 = vld [vmem:[%s6395_s5 + $0x290] sm:$0xf] }
 0x153   :  { %v2948_v2 = vld [vmem:[%s6395_s5 + $0x28] sm:$0xf0]  ;;  %v3690_v63 = vld [vmem:[%s6395_s5 + $0x5d0] sm:$0xf] }
 0x154   :  { %2345 = vmatpush.bf16.msrb.mxu2 %v3111_v6  ;;  %2321 = vmatpush.bf16.msrb.mxu0 %v3491_v15  ;;  %v4190_v3 = vld [vmem:[%s6395_s5 + $0x50c] sm:$0xf]  ;;  %v3815_v6 = vor.u32 %v4246_v58, %v3812_v59  ;;  %v4139_v15 = vld [vmem:[%s6395_s5 + $0x36c] sm:$0xf0] }
 0x155   :  { %2337 = vmatmul.bf16.vlgmr.msrb.gmra.mxu1 %v5247_v38  ;;  %v3588_v5 = vld [vmem:[%s6395_s5 + $0x528] sm:$0xf0]  ;;  %v3371_v22 = vor.u32 %v4139_v15, %v3370_v14  ;;  %v4219_v0 = vld [vmem:[%s6395_s5 + $0x5ec] sm:$0xf0] }
 0x156   :  { %2361 = vmatpush.bf16.msrb.mxu3 %v3303_v12  ;;  %2385 = vmatpush.bf16.msra.mxu1 %v3943_v13  ;;  %v4238_v10 = vld [vmem:[%s6395_s5 + $0x68c] sm:$0xf]  ;;  %v2951_v12 = vor.u32 %v4030_v1, %v2948_v2  ;;  %v3591_v13 = vor.u32 %v4190_v3, %v3588_v5  ;;  %v3275_v1 = vor.u32 %v4115_v54, %v3274_v52  ;;  %v3242_v5 = vld [vmem:[%s6395_s5 + $0x250] sm:$0xf]  ;;  %v4135_v52 = vld [vmem:[%s6395_s5 + $0x354] sm:$0xf] }
 0x157   :  { %v3780_v11 = vld [vmem:[%s6395_s5 + $0x6a8] sm:$0xf0]  ;;  %v3691_v8 = vor.u32 %v4219_v0, %v3690_v63  ;;  %v4211_v14 = vld [vmem:[%s6395_s5 + $0x5ac] sm:$0xf0]  ;;  %v3372_v54 = vld [vmem:[%s6395_s5 + $0x370] sm:$0xf0] }
 0x158   :  { %2346 = vmatpush.bf16.msrb.mxu2 %v3079_v19  ;;  %2322 = vmatpush.bf16.msrb.mxu0 %v3459_v29  ;;  %v4182_v17 = vld [vmem:[%s6395_s5 + $0x4cc] sm:$0xf]  ;;  %v3783_v19 = vor.u32 %v4238_v10, %v3780_v11  ;;  %v4267_v10 = vld [vmem:[%s6395_s5 + $0x76c] sm:$0xf0] }
 0x159   :  { %v3556_v18 = vld [vmem:[%s6395_s5 + $0x4e8] sm:$0xf0]  ;;  %v3018_v11 = vld [vmem:[%s6395_s5 + $0x90] sm:$0xf] }
 0x15a   :  { %2362 = vmatpush.bf16.msrb.mxu3 %v3271_v26  ;;  %2386 = vmatpush.bf16.msra.mxu1 %v3911_v27  ;;  %v4230_v23 = vld [vmem:[%s6395_s5 + $0x64c] sm:$0xf]  ;;  %v3559_v25 = vor.u32 %v4182_v17, %v3556_v18  ;;  %v3338_v26 = vld [vmem:[%s6395_s5 + $0x310] sm:$0xf] }
 0x15b   :  { %2323 = vmatmul.bf16.vlgmr.msrb.gmra.mxu0 %v5287_v62  ;;  %v3748_v24 = vld [vmem:[%s6395_s5 + $0x668] sm:$0xf0]  ;;  %v4131_v27 = vld [vmem:[%s6395_s5 + $0x32c] sm:$0xf0] }
 0x15c   :  { %2347 = vmatpush.bf16.msrb.mxu2 %v3047_v33  ;;  %2371 = vmatpush.bf16.msra.mxu0 %v3687_v34  ;;  %v4174_v29 = vld [vmem:[%s6395_s5 + $0x48c] sm:$0xf]  ;;  %v3751_v31 = vor.u32 %v4230_v23, %v3748_v24  ;;  %v4075_v33 = vld [vmem:[%s6395_s5 + $0x16c] sm:$0xf0]  ;;  %v3339_v34 = vor.u32 %v4131_v27, %v3338_v26  ;;  %v4151_v23 = vld [vmem:[%s6395_s5 + $0x3d4] sm:$0xf] }
 0x15d   :  { %v3524_v30 = vld [vmem:[%s6395_s5 + $0x4a8] sm:$0xf0]  ;;  %v3115_v43 = vor.u32 %v4075_v33, %v3114_v32  ;;  %v4099_v18 = vld [vmem:[%s6395_s5 + $0x22c] sm:$0xf0]  ;;  %v3436_v24 = vld [vmem:[%s6395_s5 + $0x3f0] sm:$0xf0] }
 0x15e   :  { %2363 = vmatpush.bf16.msrb.mxu3 %v3239_v40  ;;  %2387 = vmatpush.bf16.msra.mxu1 %v3879_v41  ;;  %v4222_v35 = vld [vmem:[%s6395_s5 + $0x60c] sm:$0xf]  ;;  %v3527_v39 = vor.u32 %v4174_v29, %v3524_v30  ;;  %v4123_v40 = vld [vmem:[%s6395_s5 + $0x2ec] sm:$0xf0] }
 0x15f   :  { %v3716_v36 = vld [vmem:[%s6395_s5 + $0x628] sm:$0xf0]  ;;  %v3946_v41 = vld [vmem:[%s6395_s5 + $0x7d0] sm:$0xf]  ;;  %v3307_v49 = vor.u32 %v4123_v40, %v3306_v37  ;;  %v3404_v37 = vld [vmem:[%s6395_s5 + $0x3b0] sm:$0xf0] }
 0x160   :  { %2348 = vmatpush.bf16.msrb.mxu2 %v3015_v46  ;;  %2372 = vmatpush.bf16.msra.mxu0 %v3655_v47  ;;  %v4166_v44 = vld [vmem:[%s6395_s5 + $0x44c] sm:$0xf]  ;;  %v3719_v46 = vor.u32 %v4222_v35, %v3716_v36  ;;  %v3082_v47 = vld [vmem:[%s6395_s5 + $0x110] sm:$0xf]  ;;  %v3947_v50 = vor.u32 %v4283_v42, %v3946_v41  ;;  %v4143_v36 = vld [vmem:[%s6395_s5 + $0x394] sm:$0xf] }
 0x161   :  { %v3492_v45 = vld [vmem:[%s6395_s5 + $0x468] sm:$0xf0]  ;;  %v4043_v26 = vld [vmem:[%s6395_s5 + $0x6c] sm:$0xf0] }
 0x162   :  { %2364 = vmatpush.bf16.msrb.mxu3 %v3207_v55  ;;  %2388 = vmatpush.bf16.msra.mxu1 %v3847_v56  ;;  %v3495_v53 = vor.u32 %v4166_v44, %v3492_v45  ;;  %v3914_v55 = vld [vmem:[%s6395_s5 + $0x790] sm:$0xf]  ;;  %v4158_v58 = vld [vmem:[%s6395_s5 + $0x40c] sm:$0xf]  ;;  %v3180_v44 = vld [vmem:[%s6395_s5 + $0x1f0] sm:$0xf0] }
 0x163   :  { %v4275_v56 = vld [vmem:[%s6395_s5 + $0x7ac] sm:$0xf0]  ;;  %v3460_v59 = vld [vmem:[%s6395_s5 + $0x428] sm:$0xf0] }
 0x164   :  { %2349 = vmatpush.bf16.msrb.mxu2 %v2983_v60  ;;  %2373 = vmatpush.bf16.msra.mxu0 %v3623_v61  ;;  %v3050_v60 = vld [vmem:[%s6395_s5 + $0xd0] sm:$0xf]  ;;  %v3915_v2 = vor.u32 %v4275_v56, %v3914_v55  ;;  %v3463_v3 = vor.u32 %v4158_v58, %v3460_v59  ;;  %v3148_v58 = vld [vmem:[%s6395_s5 + $0x1b0] sm:$0xf0] }
 0x165   :  { %2365 = vmatmul.bf16.vlgmr.msrb.gmra.mxu3 %v5182_v51  ;;  %v4059_v61 = vld [vmem:[%s6395_s5 + $0xec] sm:$0xf0] }
 0x166   :  { %2413 = vmatpush.bf16.msra.mxu3 %v3435_v57  ;;  %2389 = vmatpush.bf16.msra.mxu1 %v3815_v6  ;;  %v3083_v57 = vor.u32 %v4067_v48, %v3082_v47  ;;  %v4107_v6 = vld [vmem:[%s6395_s5 + $0x26c] sm:$0xf0]  ;;  %v3051_v7 = vor.u32 %v4059_v61, %v3050_v60  ;;  %v3375_v60 = vor.u32 %v4135_v52, %v3372_v54  ;;  %v3660_v52 = vld [vmem:[%s6395_s5 + $0x5b0] sm:$0xf0] }
 0x167   :  { %v3243_v15 = vor.u32 %v4107_v6, %v3242_v5  ;;  %v3626_v27 = vld [vmem:[%s6395_s5 + $0x550] sm:$0xf]  ;;  %v4095_v54 = vld [vmem:[%s6395_s5 + $0x214] sm:$0xf] }
 0x168   :  { %2350 = vmatpush.bf16.msrb.mxu2 %v2951_v12  ;;  %2374 = vmatpush.bf16.msra.mxu0 %v3591_v13  ;;  %v4051_v12 = vld [vmem:[%s6395_s5 + $0xac] sm:$0xf0] }
 0x169   :  { %v3658_v13 = vld [vmem:[%s6395_s5 + $0x590] sm:$0xf]  ;;  %v3019_v21 = vor.u32 %v4051_v12, %v3018_v11 }
 0x16a   :  { %2414 = vmatpush.bf16.msra.mxu3 %v3403_v9  ;;  %2390 = vmatpush.bf16.msra.mxu1 %v3783_v19  ;;  %v3882_v9 = vld [vmem:[%s6395_s5 + $0x750] sm:$0xf] }
 0x16b   :  { %2351 = vmatmul.bf16.vlgmr.msrb.gmra.mxu2 %v5204_v4  ;;  %v3883_v17 = vor.u32 %v4267_v10, %v3882_v9  ;;  %v3850_v19 = vld [vmem:[%s6395_s5 + $0x710] sm:$0xf] }
 0x16c   :  { %2399 = vmatpush.bf16.msra.mxu2 %v3179_v16  ;;  %2375 = vmatpush.bf16.msra.mxu0 %v3559_v25  ;;  %v3210_v16 = vld [vmem:[%s6395_s5 + $0x210] sm:$0xf]  ;;  %v3851_v30 = vor.u32 %v4259_v20, %v3850_v19 }
 0x16d   :  { %v2986_v25 = vld [vmem:[%s6395_s5 + $0x50] sm:$0xf]  ;;  %v3211_v29 = vor.u32 %v4099_v18, %v3210_v16  ;;  %v3948_v18 = vld [vmem:[%s6395_s5 + $0x7f0] sm:$0xf0] }
 0x16e   :  { %2415 = vmatpush.bf16.msra.mxu3 %v3371_v22  ;;  %2391 = vmatpush.bf16.msra.mxu1 %v3751_v31  ;;  %v3659_v22 = vor.u32 %v4211_v14, %v3658_v13  ;;  %v3439_v31 = vor.u32 %v4151_v23, %v3436_v24  ;;  %v3818_v32 = vld [vmem:[%s6395_s5 + $0x6d0] sm:$0xf]  ;;  %v4119_v14 = vld [vmem:[%s6395_s5 + $0x2d4] sm:$0xf] }
 0x16f   :  { %v4251_v33 = vld [vmem:[%s6395_s5 + $0x6ec] sm:$0xf0] }
 0x170   :  { %2400 = vmatpush.bf16.msra.mxu2 %v3147_v28  ;;  %2376 = vmatpush.bf16.msra.mxu0 %v3527_v39  ;;  %v4203_v28 = vld [vmem:[%s6395_s5 + $0x56c] sm:$0xf0]  ;;  %v3819_v45 = vor.u32 %v4251_v33, %v3818_v32 }
 0x171   :  { %v3627_v35 = vor.u32 %v4203_v28, %v3626_v27  ;;  %v2954_v39 = vld [vmem:[%s6395_s5 + $0x10] sm:$0xf]  ;;  %v3276_v27 = vld [vmem:[%s6395_s5 + $0x2b0] sm:$0xf0] }
 0x172   :  { %2416 = vmatpush.bf16.msra.mxu3 %v3339_v34  ;;  %2392 = vmatpush.bf16.msra.mxu1 %v3719_v46  ;;  %v2987_v34 = vor.u32 %v4043_v26, %v2986_v25  ;;  %v4035_v40 = vld [vmem:[%s6395_s5 + $0x2c] sm:$0xf0]  ;;  %v3407_v46 = vor.u32 %v4143_v36, %v3404_v37  ;;  %v4111_v26 = vld [vmem:[%s6395_s5 + $0x294] sm:$0xf] }
 0x173   :  { %v3594_v41 = vld [vmem:[%s6395_s5 + $0x510] sm:$0xf]  ;;  %v2955_v47 = vor.u32 %v4035_v40, %v2954_v39  ;;  %v4215_v36 = vld [vmem:[%s6395_s5 + $0x5d4] sm:$0xf]  ;;  %v3279_v39 = vor.u32 %v4111_v26, %v3276_v27  ;;  %v3378_v26 = vld [vmem:[%s6395_s5 + $0x358] sm:$0xf] }
 0x174   :  { %2401 = vmatpush.bf16.msra.mxu2 %v3115_v43  ;;  %2377 = vmatpush.bf16.msra.mxu0 %v3495_v53  ;;  %v4195_v42 = vld [vmem:[%s6395_s5 + $0x52c] sm:$0xf0]  ;;  %v4087_v43 = vld [vmem:[%s6395_s5 + $0x1d4] sm:$0xf] }
 0x175   :  { %2393 = vmatmul.bf16.vlgmr.msra.gmra.mxu1 %v5247_v38  ;;  %v3595_v48 = vor.u32 %v4195_v42, %v3594_v41  ;;  %v3183_v53 = vor.u32 %v4087_v43, %v3180_v44  ;;  %v3562_v55 = vld [vmem:[%s6395_s5 + $0x4d0] sm:$0xf]  ;;  %v3692_v37 = vld [vmem:[%s6395_s5 + $0x5f0] sm:$0xf0] }
 0x176   :  { %2417 = vmatpush.bf16.msra.mxu3 %v3307_v49  ;;  %2441 = vmatpush.bf16.msrb.mxu1 %v3947_v50  ;;  %v3786_v49 = vld [vmem:[%s6395_s5 + $0x690] sm:$0xf]  ;;  %v4103_v43 = vld [vmem:[%s6395_s5 + $0x254] sm:$0xf] }
 0x177   :  { %v4243_v50 = vld [vmem:[%s6395_s5 + $0x6ac] sm:$0xf0]  ;;  %v3244_v44 = vld [vmem:[%s6395_s5 + $0x270] sm:$0xf0] }
 0x178   :  { %2402 = vmatpush.bf16.msra.mxu2 %v3083_v57  ;;  %2378 = vmatpush.bf16.msra.mxu0 %v3463_v3  ;;  %v4187_v56 = vld [vmem:[%s6395_s5 + $0x4ec] sm:$0xf0]  ;;  %v4079_v57 = vld [vmem:[%s6395_s5 + $0x194] sm:$0xf]  ;;  %v3787_v59 = vor.u32 %v4243_v50, %v3786_v49 }
 0x179   :  { %v3563_v61 = vor.u32 %v4187_v56, %v3562_v55  ;;  %v3754_v63 = vld [vmem:[%s6395_s5 + $0x650] sm:$0xf]  ;;  %v3340_v3 = vld [vmem:[%s6395_s5 + $0x330] sm:$0xf0] }
 0x17a   :  { %2418 = vmatpush.bf16.msra.mxu3 %v3275_v1  ;;  %2442 = vmatpush.bf16.msrb.mxu1 %v3915_v2  ;;  %v4235_v0 = vld [vmem:[%s6395_s5 + $0x66c] sm:$0xf0]  ;;  %v4127_v1 = vld [vmem:[%s6395_s5 + $0x314] sm:$0xf]  ;;  %v3151_v2 = vor.u32 %v4079_v57, %v3148_v58 }
 0x17b   :  { %2379 = vmatmul.bf16.vlgmr.msra.gmra.mxu0 %v5287_v62  ;;  %v3530_v5 = vld [vmem:[%s6395_s5 + $0x490] sm:$0xf]  ;;  %v3755_v9 = vor.u32 %v4235_v0, %v3754_v63  ;;  %v3343_v11 = vor.u32 %v4127_v1, %v3340_v3  ;;  %v3020_v49 = vld [vmem:[%s6395_s5 + $0xb0] sm:$0xf0]  ;;  %v4156_v63 = vld [vmem:[%s6395_s5 + $0x3f4] sm:$0xf0] }
 0x17c   :  { %2403 = vmatpush.bf16.msra.mxu2 %v3051_v7  ;;  %2427 = vmatpush.bf16.msrb.mxu0 %v3691_v8  ;;  %v4179_v6 = vld [vmem:[%s6395_s5 + $0x4ac] sm:$0xf0]  ;;  %v4071_v7 = vld [vmem:[%s6395_s5 + $0x154] sm:$0xf] }
 0x17d   :  { %v3116_v8 = vld [vmem:[%s6395_s5 + $0x170] sm:$0xf0]  ;;  %v3722_v10 = vld [vmem:[%s6395_s5 + $0x610] sm:$0xf]  ;;  %v3531_v12 = vor.u32 %v4179_v6, %v3530_v5 }
 0x17e   :  { %2419 = vmatpush.bf16.msra.mxu3 %v3243_v15  ;;  %2443 = vmatpush.bf16.msrb.mxu1 %v3883_v17  ;;  %v4227_v13 = vld [vmem:[%s6395_s5 + $0x62c] sm:$0xf0]  ;;  %v3308_v15 = vld [vmem:[%s6395_s5 + $0x2f0] sm:$0xf0]  ;;  %v3119_v16 = vor.u32 %v4071_v7, %v3116_v8 }
 0x17f   :  { %v4279_v17 = vld [vmem:[%s6395_s5 + $0x7d4] sm:$0xf]  ;;  %v3498_v19 = vld [vmem:[%s6395_s5 + $0x450] sm:$0xf]  ;;  %v3723_v23 = vor.u32 %v4227_v13, %v3722_v10  ;;  %v3311_v24 = vor.u32 %v4119_v14, %v3308_v15  ;;  %v4148_v13 = vld [vmem:[%s6395_s5 + $0x3b4] sm:$0xf0] }
 0x180   :  { %2404 = vmatpush.bf16.msra.mxu2 %v3019_v21  ;;  %2428 = vmatpush.bf16.msrb.mxu0 %v3659_v22  ;;  %v4171_v20 = vld [vmem:[%s6395_s5 + $0x46c] sm:$0xf0]  ;;  %v4063_v21 = vld [vmem:[%s6395_s5 + $0x114] sm:$0xf]  ;;  %v3951_v25 = vor.u32 %v4279_v17, %v3948_v18  ;;  %v3186_v18 = vld [vmem:[%s6395_s5 + $0x1d8] sm:$0xf] }
 0x181   :  { %v3084_v22 = vld [vmem:[%s6395_s5 + $0x130] sm:$0xf0]  ;;  %v3499_v28 = vor.u32 %v4171_v20, %v3498_v19  ;;  %v3466_v32 = vld [vmem:[%s6395_s5 + $0x410] sm:$0xf]  ;;  %v4092_v19 = vld [vmem:[%s6395_s5 + $0x1f4] sm:$0xf0] }
 0x182   :  { %2420 = vmatpush.bf16.msra.mxu3 %v3211_v29  ;;  %2444 = vmatpush.bf16.msrb.mxu1 %v3851_v30  ;;  %v3087_v29 = vor.u32 %v4063_v21, %v3084_v22  ;;  %v4271_v30 = vld [vmem:[%s6395_s5 + $0x794] sm:$0xf]  ;;  %v4163_v33 = vld [vmem:[%s6395_s5 + $0x42c] sm:$0xf0]  ;;  %v3187_v27 = vor.u32 %v4092_v19, %v3186_v18 }
 0x183   :  { %v3467_v41 = vor.u32 %v4163_v33, %v3466_v32  ;;  %v4207_v50 = vld [vmem:[%s6395_s5 + $0x594] sm:$0xf]  ;;  %v4084_v32 = vld [vmem:[%s6395_s5 + $0x1b4] sm:$0xf0] }
 0x184   :  { %2405 = vmatpush.bf16.msra.mxu2 %v2987_v34  ;;  %2429 = vmatpush.bf16.msrb.mxu0 %v3627_v35  ;;  %v4055_v34 = vld [vmem:[%s6395_s5 + $0xd4] sm:$0xf] }
 0x185   :  { %2421 = vmatmul.bf16.vlgmr.msra.gmra.mxu3 %v5182_v51  ;;  %v3052_v35 = vld [vmem:[%s6395_s5 + $0xf0] sm:$0xf0] }
 0x186   :  { %2469 = vmatpush.bf16.msrb.mxu3 %v3439_v31  ;;  %2445 = vmatpush.bf16.msrb.mxu1 %v3819_v45  ;;  %v3916_v31 = vld [vmem:[%s6395_s5 + $0x7b0] sm:$0xf0]  ;;  %v3055_v42 = vor.u32 %v4055_v34, %v3052_v35 }
 0x187   :  { %v3919_v40 = vor.u32 %v4271_v30, %v3916_v31  ;;  %v4263_v45 = vld [vmem:[%s6395_s5 + $0x754] sm:$0xf]  ;;  %v3154_v31 = vld [vmem:[%s6395_s5 + $0x198] sm:$0xf] }
 0x188   :  { %2406 = vmatpush.bf16.msra.mxu2 %v2955_v47  ;;  %2430 = vmatpush.bf16.msrb.mxu0 %v3595_v48  ;;  %v3884_v47 = vld [vmem:[%s6395_s5 + $0x770] sm:$0xf0] }
 0x189   :  { %v4047_v48 = vld [vmem:[%s6395_s5 + $0x94] sm:$0xf]  ;;  %v3887_v55 = vor.u32 %v4263_v45, %v3884_v47  ;;  %v4076_v45 = vld [vmem:[%s6395_s5 + $0x174] sm:$0xf0] }
 0x18a   :  { %2470 = vmatpush.bf16.msrb.mxu3 %v3407_v46  ;;  %2446 = vmatpush.bf16.msrb.mxu1 %v3787_v59  ;;  %v3695_v46 = vor.u32 %v4215_v36, %v3692_v37  ;;  %v3023_v56 = vor.u32 %v4047_v48, %v3020_v49  ;;  %v3212_v57 = vld [vmem:[%s6395_s5 + $0x230] sm:$0xf0] }
 0x18b   :  { %2407 = vmatmul.bf16.vlgmr.msra.gmra.mxu2 %v5204_v4  ;;  %v4255_v58 = vld [vmem:[%s6395_s5 + $0x714] sm:$0xf]  ;;  %v3215_v5 = vor.u32 %v4095_v54, %v3212_v57 }
 0x18c   :  { %2455 = vmatpush.bf16.msrb.mxu2 %v3183_v53  ;;  %2431 = vmatpush.bf16.msrb.mxu0 %v3563_v61  ;;  %v3247_v53 = vor.u32 %v4103_v43, %v3244_v44  ;;  %v3852_v59 = vld [vmem:[%s6395_s5 + $0x730] sm:$0xf0]  ;;  %v3442_v61 = vld [vmem:[%s6395_s5 + $0x3d8] sm:$0xf] }
 0x18d   :  { %v4039_v0 = vld [vmem:[%s6395_s5 + $0x54] sm:$0xf]  ;;  %v3855_v6 = vor.u32 %v4255_v58, %v3852_v59  ;;  %v3443_v7 = vor.u32 %v4156_v63, %v3442_v61  ;;  %v3122_v44 = vld [vmem:[%s6395_s5 + $0x158] sm:$0xf] }
 0x18e   :  { %2471 = vmatpush.bf16.msrb.mxu3 %v3375_v60  ;;  %2447 = vmatpush.bf16.msrb.mxu1 %v3755_v9  ;;  %v3663_v60 = vor.u32 %v4207_v50, %v3660_v52  ;;  %v2988_v1 = vld [vmem:[%s6395_s5 + $0x70] sm:$0xf0]  ;;  %v3314_v52 = vld [vmem:[%s6395_s5 + $0x2d8] sm:$0xf]  ;;  %v3123_v54 = vor.u32 %v4076_v45, %v3122_v44 }
 0x18f   :  { %v3628_v3 = vld [vmem:[%s6395_s5 + $0x570] sm:$0xf0]  ;;  %v2991_v10 = vor.u32 %v4039_v0, %v2988_v1  ;;  %v3090_v59 = vld [vmem:[%s6395_s5 + $0x118] sm:$0xf] }
 0x190   :  { %2456 = vmatpush.bf16.msrb.mxu2 %v3151_v2  ;;  %2432 = vmatpush.bf16.msrb.mxu0 %v3531_v12  ;;  %v4199_v2 = vld [vmem:[%s6395_s5 + $0x554] sm:$0xf]  ;;  %v3410_v12 = vld [vmem:[%s6395_s5 + $0x398] sm:$0xf] }
 0x191   :  { %v4247_v8 = vld [vmem:[%s6395_s5 + $0x6d4] sm:$0xf]  ;;  %v3411_v21 = vor.u32 %v4148_v13, %v3410_v12  ;;  %v3282_v1 = vld [vmem:[%s6395_s5 + $0x298] sm:$0xf] }
 0x192   :  { %2472 = vmatpush.bf16.msrb.mxu3 %v3343_v11  ;;  %2448 = vmatpush.bf16.msrb.mxu1 %v3723_v23  ;;  %v3820_v9 = vld [vmem:[%s6395_s5 + $0x6f0] sm:$0xf0]  ;;  %v3631_v11 = vor.u32 %v4199_v2, %v3628_v3  ;;  %v4116_v2 = vld [vmem:[%s6395_s5 + $0x2b4] sm:$0xf0] }
 0x193   :  { %v4031_v14 = vld [vmem:[%s6395_s5 + $0x14] sm:$0xf]  ;;  %v3823_v20 = vor.u32 %v4247_v8, %v3820_v9  ;;  %v3698_v12 = vld [vmem:[%s6395_s5 + $0x5d8] sm:$0xf] }
 0x194   :  { %2457 = vmatpush.bf16.msrb.mxu2 %v3119_v16  ;;  %2433 = vmatpush.bf16.msrb.mxu0 %v3499_v28  ;;  %v2956_v15 = vld [vmem:[%s6395_s5 + $0x30] sm:$0xf0]  ;;  %v4140_v28 = vld [vmem:[%s6395_s5 + $0x374] sm:$0xf0] }
 0x195   :  { %2449 = vmatmul.bf16.vlgmr.msrb.gmra.mxu1 %v5247_v38  ;;  %v4191_v16 = vld [vmem:[%s6395_s5 + $0x514] sm:$0xf]  ;;  %v2959_v22 = vor.u32 %v4031_v14, %v2956_v15  ;;  %v3379_v34 = vor.u32 %v4140_v28, %v3378_v26  ;;  %v4220_v13 = vld [vmem:[%s6395_s5 + $0x5f4] sm:$0xf0]  ;;  %v3283_v14 = vor.u32 %v4116_v2, %v3282_v1 }
 0x196   :  { %2473 = vmatpush.bf16.msrb.mxu3 %v3311_v24  ;;  %2497 = vmatpush.bf16.msra.mxu1 %v3951_v25  ;;  %v3596_v17 = vld [vmem:[%s6395_s5 + $0x530] sm:$0xf0]  ;;  %v3026_v26 = vld [vmem:[%s6395_s5 + $0x98] sm:$0xf] }
 0x197   :  { %v3599_v23 = vor.u32 %v4191_v16, %v3596_v17  ;;  %v4239_v24 = vld [vmem:[%s6395_s5 + $0x694] sm:$0xf]  ;;  %v6063_v16 = vld [vmem:[%s6396_s6] sm:$0xff]  ;;  %v4044_v45 = vld [vmem:[%s6395_s5 + $0x74] sm:$0xf0] }
 0x198   :  { %2458 = vmatpush.bf16.msrb.mxu2 %v3087_v29  ;;  %2434 = vmatpush.bf16.msrb.mxu0 %v3467_v41  ;;  %v3788_v25 = vld [vmem:[%s6395_s5 + $0x6b0] sm:$0xf0]  ;;  %v4132_v41 = vld [vmem:[%s6395_s5 + $0x334] sm:$0xf0]  ;;  %v879_v28 = vperm.slane %v6063_v16, 0 }
 0x199   :  { %v4183_v29 = vld [vmem:[%s6395_s5 + $0x4d4] sm:$0xf]  ;;  %v3791_v33 = vor.u32 %v4239_v24, %v3788_v25  ;;  %v3699_v24 = vor.u32 %v4220_v13, %v3698_v12  ;;  %v4268_v25 = vld [vmem:[%s6395_s5 + $0x774] sm:$0xf0] }
 0x19a   :  { %2474 = vmatpush.bf16.msrb.mxu3 %v3279_v39  ;;  %2498 = vmatpush.bf16.msra.mxu1 %v3919_v40  ;;  %v3564_v30 = vld [vmem:[%s6395_s5 + $0x4f0] sm:$0xf0]  ;;  %v3346_v39 = vld [vmem:[%s6395_s5 + $0x318] sm:$0xf]  ;;  %v3155_v40 = vor.u32 %v4084_v32, %v3154_v31 }
 0x19b   :  { %2435 = vmatmul.bf16.vlgmr.msrb.gmra.mxu0 %v5287_v62  ;;  %v3567_v35 = vor.u32 %v4183_v29, %v3564_v30  ;;  %v4231_v36 = vld [vmem:[%s6395_s5 + $0x654] sm:$0xf]  ;;  %v3347_v48 = vor.u32 %v4132_v41, %v3346_v39  ;;  %v3666_v29 = vld [vmem:[%s6395_s5 + $0x598] sm:$0xf]  ;;  %v4152_v41 = vld [vmem:[%s6395_s5 + $0x3dc] sm:$0xf] }
 0x19c   :  { %2459 = vmatpush.bf16.msrb.mxu2 %v3055_v42  ;;  %2483 = vmatpush.bf16.msra.mxu0 %v3695_v46  ;;  %v3756_v37 = vld [vmem:[%s6395_s5 + $0x670] sm:$0xf0]  ;;  %v4212_v30 = vld [vmem:[%s6395_s5 + $0x5b4] sm:$0xf0] }
 0x19d   :  { %v4175_v42 = vld [vmem:[%s6395_s5 + $0x494] sm:$0xf]  ;;  %v3759_v46 = vor.u32 %v4231_v36, %v3756_v37  ;;  %v3218_v32 = vld [vmem:[%s6395_s5 + $0x218] sm:$0xf] }
 0x19e   :  { %2475 = vmatpush.bf16.msrb.mxu3 %v3247_v53  ;;  %2499 = vmatpush.bf16.msra.mxu1 %v3887_v55  ;;  %v3532_v43 = vld [vmem:[%s6395_s5 + $0x4b0] sm:$0xf0]  ;;  %v4124_v53 = vld [vmem:[%s6395_s5 + $0x2f4] sm:$0xf0] }
 0x19f   :  { %v4223_v47 = vld [vmem:[%s6395_s5 + $0x614] sm:$0xf]  ;;  %v3535_v49 = vor.u32 %v4175_v42, %v3532_v43  ;;  %v3954_v55 = vld [vmem:[%s6395_s5 + $0x7d8] sm:$0xf]  ;;  %v3315_v63 = vor.u32 %v4124_v53, %v3314_v52  ;;  %v3444_v42 = vld [vmem:[%s6395_s5 + $0x3f8] sm:$0xf0] }
 0x1a0   :  { %2460 = vmatpush.bf16.msrb.mxu2 %v3023_v56  ;;  %2484 = vmatpush.bf16.msra.mxu0 %v3663_v60  ;;  %v3724_v50 = vld [vmem:[%s6395_s5 + $0x630] sm:$0xf0]  ;;  %v4284_v56 = vld [vmem:[%s6395_s5 + $0x7f4] sm:$0xf0] }
 0x1a1   :  { %v4167_v57 = vld [vmem:[%s6395_s5 + $0x454] sm:$0xf]  ;;  %v4068_v60 = vld [vmem:[%s6395_s5 + $0x134] sm:$0xf0]  ;;  %v3727_v61 = vor.u32 %v4223_v47, %v3724_v50  ;;  %v3955_v0 = vor.u32 %v4284_v56, %v3954_v55  ;;  %v3447_v50 = vor.u32 %v4152_v41, %v3444_v42 }
 0x1a2   :  { %2476 = vmatpush.bf16.msrb.mxu3 %v3215_v5  ;;  %2500 = vmatpush.bf16.msra.mxu1 %v3855_v6  ;;  %v3500_v58 = vld [vmem:[%s6395_s5 + $0x470] sm:$0xf0]  ;;  %v3091_v5 = vor.u32 %v4068_v60, %v3090_v59  ;;  %v3922_v6 = vld [vmem:[%s6395_s5 + $0x798] sm:$0xf] }
 0x1a3   :  { %v3503_v3 = vor.u32 %v4167_v57, %v3500_v58  ;;  %v4159_v8 = vld [vmem:[%s6395_s5 + $0x414] sm:$0xf]  ;;  %v3858_v36 = vld [vmem:[%s6395_s5 + $0x718] sm:$0xf]  ;;  %v4144_v57 = vld [vmem:[%s6395_s5 + $0x39c] sm:$0xf] }
 0x1a4   :  { %2461 = vmatpush.bf16.msrb.mxu2 %v2991_v10  ;;  %2485 = vmatpush.bf16.msra.mxu0 %v3631_v11  ;;  %v3468_v9 = vld [vmem:[%s6395_s5 + $0x430] sm:$0xf0]  ;;  %v3058_v10 = vld [vmem:[%s6395_s5 + $0xd8] sm:$0xf]  ;;  %v3412_v58 = vld [vmem:[%s6395_s5 + $0x3b8] sm:$0xf0] }
 0x1a5   :  { %2477 = vmatmul.bf16.vlgmr.msrb.gmra.mxu3 %v5182_v51  ;;  %v4060_v11 = vld [vmem:[%s6395_s5 + $0xf4] sm:$0xf0]  ;;  %v3471_v18 = vor.u32 %v4159_v8, %v3468_v9  ;;  %v3415_v8 = vor.u32 %v4144_v57, %v3412_v58 }
 0x1a6   :  { %2525 = vmatpush.bf16.msra.mxu3 %v3443_v7  ;;  %2501 = vmatpush.bf16.msra.mxu1 %v3823_v20  ;;  %v4276_v7 = vld [vmem:[%s6395_s5 + $0x7b4] sm:$0xf0]  ;;  %v3059_v19 = vor.u32 %v4060_v11, %v3058_v10 }
 0x1a7   :  { %v3923_v15 = vor.u32 %v4276_v7, %v3922_v6  ;;  %v3250_v20 = vld [vmem:[%s6395_s5 + $0x258] sm:$0xf] }
 0x1a8   :  { %2462 = vmatpush.bf16.msrb.mxu2 %v2959_v22  ;;  %2486 = vmatpush.bf16.msra.mxu0 %v3599_v23  ;;  %v2198_v17 = vpop.f32.mrf.mxu3  ;;  %v3890_v22 = vld [vmem:[%s6395_s5 + $0x758] sm:$0xf] }
 0x1a9   :  { %v4260_v37 = vld [vmem:[%s6395_s5 + $0x734] sm:$0xf0] }
 0x1aa   :  { %2526 = vmatpush.bf16.msra.mxu3 %v3411_v21  ;;  %2502 = vmatpush.bf16.msra.mxu1 %v3791_v33  ;;  %v4108_v21 = vld [vmem:[%s6395_s5 + $0x274] sm:$0xf0]  ;;  %v3891_v33 = vor.u32 %v4268_v25, %v3890_v22  ;;  %v4080_v22 = vld [vmem:[%s6395_s5 + $0x19c] sm:$0xf]  ;;  %v880_v25 = vperm.slane %v6063_v16, 1 }
 0x1ab   :  { %2463 = vmatmul.bf16.vlgmr.msrb.gmra.mxu2 %v5204_v4  ;;  %v3251_v31 = vor.u32 %v4108_v21, %v3250_v20  ;;  %v2994_v43 = vld [vmem:[%s6395_s5 + $0x58] sm:$0xf] }
 0x1ac   :  { %2511 = vmatpush.bf16.msra.mxu2 %v3187_v27  ;;  %2487 = vmatpush.bf16.msra.mxu0 %v3567_v35  ;;  %v4052_v27 = vld [vmem:[%s6395_s5 + $0xb4] sm:$0xf0]  ;;  %v2995_v55 = vor.u32 %v4044_v45, %v2994_v43 }
 0x1ad   :  { %v4100_v35 = vld [vmem:[%s6395_s5 + $0x234] sm:$0xf0] }
 0x1ae   :  { %2527 = vmatpush.bf16.msra.mxu3 %v3379_v34  ;;  %2503 = vmatpush.bf16.msra.mxu1 %v3759_v46  ;;  %v2184_v23 = vpop.f32.mrf.mxu2  ;;  %v3027_v34 = vor.u32 %v4052_v27, %v3026_v26  ;;  %v3634_v46 = vld [vmem:[%s6395_s5 + $0x558] sm:$0xf] }
 0x1af   :  { %v2185_v44 = vadd.f32 %v2184_v23, %v879_v28  ;;  %v4204_v47 = vld [vmem:[%s6395_s5 + $0x574] sm:$0xf0]  ;;  %v3156_v23 = vld [vmem:[%s6395_s5 + $0x1b8] sm:$0xf0] }
 0x1b0   :  { %2512 = vmatpush.bf16.msra.mxu2 %v3155_v40  ;;  %2488 = vmatpush.bf16.msra.mxu0 %v3535_v49  ;;  %v3667_v40 = vor.u32 %v4212_v30, %v3666_v29  ;;  %v3859_v49 = vor.u32 %v4260_v37, %v3858_v36  ;;  %v3826_v52 = vld [vmem:[%s6395_s5 + $0x6d8] sm:$0xf]  ;;  %v3635_v56 = vor.u32 %v4204_v47, %v3634_v46  ;;  %v2200_v60 = vpop.f32.mrf.mxu3 }
 0x1b1   :  { %v4252_v53 = vld [vmem:[%s6395_s5 + $0x6f4] sm:$0xf0] }
 0x1b2   :  { %2528 = vmatpush.bf16.msra.mxu3 %v3347_v48  ;;  %2504 = vmatpush.bf16.msra.mxu1 %v3727_v61  ;;  %v2226_v39 = vpop.f32.mrf.mxu1  ;;  %v3219_v48 = vor.u32 %v4100_v35, %v3218_v32  ;;  %v2962_v59 = vld [vmem:[%s6395_s5 + $0x18] sm:$0xf]  ;;  %v2199_v61 = vadd.f32 %v2198_v17, %v2185_v44  ;;  %v3827_v7 = vor.u32 %v4252_v53, %v3826_v52 }
 0x1b3   :  { %v4196_v1 = vld [vmem:[%s6395_s5 + $0x534] sm:$0xf0] }
 0x1b4   :  { %2513 = vmatpush.bf16.msra.mxu2 %v3123_v54  ;;  %2489 = vmatpush.bf16.msra.mxu0 %v3503_v3  ;;  %v4088_v3 = vld [vmem:[%s6395_s5 + $0x1dc] sm:$0xf]  ;;  %v3794_v12 = vld [vmem:[%s6395_s5 + $0x698] sm:$0xf] }
 0x1b5   :  { %2505 = vmatmul.bf16.vlgmr.msra.gmra.mxu1 %v5247_v38  ;;  %v4244_v13 = vld [vmem:[%s6395_s5 + $0x6b4] sm:$0xf0] }
 0x1b6   :  { %2529 = vmatpush.bf16.msra.mxu3 %v3315_v63  ;;  %2553 = vmatpush.bf16.msrb.mxu1 %v3955_v0  ;;  %v2186_v54 = vpop.f32.mrf.mxu2  ;;  %v4036_v63 = vld [vmem:[%s6395_s5 + $0x34] sm:$0xf0] }
 0x1b7   :  { %v3602_v0 = vld [vmem:[%s6395_s5 + $0x518] sm:$0xf]  ;;  %v2963_v10 = vor.u32 %v4036_v63, %v2962_v59  ;;  %v4064_v59 = vld [vmem:[%s6395_s5 + $0x11c] sm:$0xf] }
 0x1b8   :  { %2514 = vmatpush.bf16.msra.mxu2 %v3091_v5  ;;  %2490 = vmatpush.bf16.msra.mxu0 %v3471_v18  ;;  %v2212_v2 = vpop.f32.mrf.mxu0  ;;  %v3188_v5 = vld [vmem:[%s6395_s5 + $0x1f8] sm:$0xf0]  ;;  %v3603_v11 = vor.u32 %v4196_v1, %v3602_v0  ;;  %v3570_v20 = vld [vmem:[%s6395_s5 + $0x4d8] sm:$0xf]  ;;  %v2254_v41 = vpop.f32.mrf.mxu3 }
 0x1b9   :  { %v2213_v6 = vadd.f32 %v2212_v2, %v2199_v61  ;;  %v3191_v18 = vor.u32 %v4088_v3, %v3188_v5  ;;  %v4188_v21 = vld [vmem:[%s6395_s5 + $0x4f4] sm:$0xf0]  ;;  %v4112_v2 = vld [vmem:[%s6395_s5 + $0x29c] sm:$0xf] }
 0x1ba   :  { %2530 = vmatpush.bf16.msra.mxu3 %v3283_v14  ;;  %2554 = vmatpush.bf16.msrb.mxu1 %v3923_v15  ;;  %v2228_v9 = vpop.f32.mrf.mxu1  ;;  %v4136_v14 = vld [vmem:[%s6395_s5 + $0x35c] sm:$0xf]  ;;  %v2187_v15 = vadd.f32 %v2186_v54, %v879_v28  ;;  %v3571_v28 = vor.u32 %v4188_v21, %v3570_v20  ;;  %v3762_v29 = vld [vmem:[%s6395_s5 + $0x658] sm:$0xf] }
 0x1bb   :  { %2491 = vmatmul.bf16.vlgmr.msra.gmra.mxu0 %v5287_v62  ;;  %v2227_v17 = vadd.f32 %v2226_v39, %v2213_v6  ;;  %v4236_v30 = vld [vmem:[%s6395_s5 + $0x674] sm:$0xf0]  ;;  %v4072_v39 = vld [vmem:[%s6395_s5 + $0x15c] sm:$0xf] }
 0x1bc   :  { %2515 = vmatpush.bf16.msra.mxu2 %v3059_v19  ;;  %2539 = vmatpush.bf16.msrb.mxu0 %v3699_v24  ;;  %v3380_v19 = vld [vmem:[%s6395_s5 + $0x378] sm:$0xf0]  ;;  %v3795_v24 = vor.u32 %v4244_v13, %v3794_v12  ;;  %v2201_v32 = vadd.f32 %v2200_v60, %v2187_v15  ;;  %v3538_v35 = vld [vmem:[%s6395_s5 + $0x498] sm:$0xf]  ;;  %v3763_v43 = vor.u32 %v4236_v30, %v3762_v29 }
 0x1bd   :  { %2623 = vst [vmem:[#allocation2] sm:$0xff] %v2227_v17  ;;  %v3383_v27 = vor.u32 %v4136_v14, %v3380_v19  ;;  %v4180_v36 = vld [vmem:[%s6395_s5 + $0x4b4] sm:$0xf0]  ;;  %v4280_v54 = vld [vmem:[%s6395_s5 + $0x7dc] sm:$0xf] }
 0x1be   :  { %2531 = vmatpush.bf16.msra.mxu3 %v3251_v31  ;;  %2555 = vmatpush.bf16.msrb.mxu1 %v3891_v33  ;;  %v2240_v26 = vpop.f32.mrf.mxu2  ;;  %v4128_v31 = vld [vmem:[%s6395_s5 + $0x31c] sm:$0xf]  ;;  %v3159_v33 = vor.u32 %v4080_v22, %v3156_v23  ;;  %v3730_v44 = vld [vmem:[%s6395_s5 + $0x618] sm:$0xf]  ;;  %v3539_v46 = vor.u32 %v4180_v36, %v3538_v35  ;;  %v881_v36 = vperm.slane %v6063_v16, 2 }
 0x1bf   :  { %v4228_v47 = vld [vmem:[%s6395_s5 + $0x634] sm:$0xf0]  ;;  %v3092_v60 = vld [vmem:[%s6395_s5 + $0x138] sm:$0xf0] }
 0x1c0   :  { %2516 = vmatpush.bf16.msra.mxu2 %v3027_v34  ;;  %2540 = vmatpush.bf16.msrb.mxu0 %v3667_v40  ;;  %v3348_v34 = vld [vmem:[%s6395_s5 + $0x338] sm:$0xf0]  ;;  %v2214_v37 = vpop.f32.mrf.mxu0  ;;  %v4172_v58 = vld [vmem:[%s6395_s5 + $0x474] sm:$0xf0]  ;;  %v3731_v61 = vor.u32 %v4228_v47, %v3730_v44  ;;  %v2256_v22 = vpop.f32.mrf.mxu3 }
 0x1c1   :  { %v3124_v40 = vld [vmem:[%s6395_s5 + $0x178] sm:$0xf0]  ;;  %v2215_v42 = vadd.f32 %v2214_v37, %v2201_v32  ;;  %v3351_v45 = vor.u32 %v4128_v31, %v3348_v34 }
 0x1c2   :  { %2532 = vmatpush.bf16.msra.mxu3 %v3219_v48  ;;  %2556 = vmatpush.bf16.msrb.mxu1 %v3859_v49  ;;  %v4120_v48 = vld [vmem:[%s6395_s5 + $0x2dc] sm:$0xf]  ;;  %v3127_v53 = vor.u32 %v4072_v39, %v3124_v40  ;;  %v2282_v57 = vpop.f32.mrf.mxu1 }
 0x1c3   :  { %v3316_v49 = vld [vmem:[%s6395_s5 + $0x2f8] sm:$0xf0]  ;;  %v2229_v52 = vadd.f32 %v2228_v9, %v2215_v42 }
 0x1c4   :  { %2517 = vmatpush.bf16.msra.mxu2 %v2995_v55  ;;  %2541 = vmatpush.bf16.msrb.mxu0 %v3635_v56  ;;  %v3956_v55 = vld [vmem:[%s6395_s5 + $0x7f8] sm:$0xf0]  ;;  %v3506_v56 = vld [vmem:[%s6395_s5 + $0x458] sm:$0xf]  ;;  %v3319_v0 = vor.u32 %v4120_v48, %v3316_v49 }
 0x1c5   :  { %2533 = vmatmul.bf16.vlgmr.msra.gmra.mxu3 %v5182_v51  ;;  %2632 = vst [vmem:[#allocation2 + $0x40] sm:$0xff] %v2229_v52  ;;  %v3959_v1 = vor.u32 %v4280_v54, %v3956_v55  ;;  %v3284_v3 = vld [vmem:[%s6395_s5 + $0x2b8] sm:$0xf0]  ;;  %v3507_v6 = vor.u32 %v4172_v58, %v3506_v56 }
 0x1c6   :  { %2581 = vmatpush.bf16.msrb.mxu3 %v3447_v50  ;;  %2557 = vmatpush.bf16.msrb.mxu1 %v3827_v7  ;;  %v2241_v50 = vadd.f32 %v2240_v26, %v880_v25  ;;  %v2242_v63 = vpop.f32.mrf.mxu2  ;;  %v4272_v5 = vld [vmem:[%s6395_s5 + $0x79c] sm:$0xf]  ;;  %v3287_v19 = vor.u32 %v4112_v2, %v3284_v3 }
 0x1c7   :  { %v3924_v9 = vld [vmem:[%s6395_s5 + $0x7b8] sm:$0xf0]  ;;  %v2243_v23 = vadd.f32 %v2242_v63, %v880_v25 }
 0x1c8   :  { %2518 = vmatpush.bf16.msra.mxu2 %v2963_v10  ;;  %2542 = vmatpush.bf16.msrb.mxu0 %v3603_v11  ;;  %v2255_v7 = vadd.f32 %v2254_v41, %v2241_v50  ;;  %v3474_v10 = vld [vmem:[%s6395_s5 + $0x418] sm:$0xf]  ;;  %v2268_v12 = vpop.f32.mrf.mxu0  ;;  %v4056_v13 = vld [vmem:[%s6395_s5 + $0xdc] sm:$0xf]  ;;  %v3927_v20 = vor.u32 %v4272_v5, %v3924_v9  ;;  %v2310_v2 = vpop.f32.mrf.mxu3 }
 0x1c9   :  { %v4164_v11 = vld [vmem:[%s6395_s5 + $0x434] sm:$0xf0]  ;;  %v3060_v14 = vld [vmem:[%s6395_s5 + $0xf8] sm:$0xf0]  ;;  %v2257_v41 = vadd.f32 %v2256_v22, %v2243_v23 }
 0x1ca   :  { %2582 = vmatpush.bf16.msrb.mxu3 %v3415_v8  ;;  %2558 = vmatpush.bf16.msrb.mxu1 %v3795_v24  ;;  %v3095_v8 = vor.u32 %v4064_v59, %v3092_v60  ;;  %v2269_v15 = vadd.f32 %v2268_v12, %v2255_v7  ;;  %v4216_v17 = vld [vmem:[%s6395_s5 + $0x5dc] sm:$0xf]  ;;  %v3475_v21 = vor.u32 %v4164_v11, %v3474_v10  ;;  %v2284_v35 = vpop.f32.mrf.mxu1 }
 0x1cb   :  { %2519 = vmatmul.bf16.vlgmr.msra.gmra.mxu2 %v5204_v4  ;;  %v3063_v26 = vor.u32 %v4056_v13, %v3060_v14  ;;  %v4264_v29 = vld [vmem:[%s6395_s5 + $0x75c] sm:$0xf] }
 0x1cc   :  { %2567 = vmatpush.bf16.msrb.mxu2 %v3191_v18  ;;  %2543 = vmatpush.bf16.msrb.mxu0 %v3571_v28  ;;  %v3700_v18 = vld [vmem:[%s6395_s5 + $0x5f8] sm:$0xf0]  ;;  %v2283_v24 = vadd.f32 %v2282_v57, %v2269_v15 }
 0x1cd   :  { %v3252_v28 = vld [vmem:[%s6395_s5 + $0x278] sm:$0xf0]  ;;  %v3703_v30 = vor.u32 %v4216_v17, %v3700_v18 }
 0x1ce   :  { %2583 = vmatpush.bf16.msrb.mxu3 %v3383_v27  ;;  %2559 = vmatpush.bf16.msrb.mxu1 %v3763_v43  ;;  %v4104_v27 = vld [vmem:[%s6395_s5 + $0x25c] sm:$0xf]  ;;  %2624 = vst [vmem:[#allocation2 + $0x8] sm:$0xff] %v2283_v24  ;;  %v2296_v39 = vpop.f32.mrf.mxu2 }
 0x1cf   :  { %v3892_v25 = vld [vmem:[%s6395_s5 + $0x778] sm:$0xf0]  ;;  %v3255_v37 = vor.u32 %v4104_v27, %v3252_v28  ;;  %v2297_v60 = vadd.f32 %v2296_v39, %v881_v36 }
 0x1d0   :  { %2568 = vmatpush.bf16.msrb.mxu2 %v3159_v33  ;;  %2544 = vmatpush.bf16.msrb.mxu0 %v3539_v46  ;;  %v4048_v31 = vld [vmem:[%s6395_s5 + $0x9c] sm:$0xf]  ;;  %v3895_v40 = vor.u32 %v4264_v29, %v3892_v25  ;;  %v2270_v46 = vpop.f32.mrf.mxu0  ;;  %v2312_v27 = vpop.f32.mrf.mxu3 }
 0x1d1   :  { %v3028_v32 = vld [vmem:[%s6395_s5 + $0xb8] sm:$0xf0]  ;;  %v2271_v52 = vadd.f32 %v2270_v46, %v2257_v41  ;;  %v2311_v9 = vadd.f32 %v2310_v2, %v2297_v60 }
 0x1d2   :  { %2584 = vmatpush.bf16.msrb.mxu3 %v3351_v45  ;;  %2560 = vmatpush.bf16.msrb.mxu1 %v3731_v61  ;;  %v4208_v33 = vld [vmem:[%s6395_s5 + $0x59c] sm:$0xf]  ;;  %v3031_v42 = vor.u32 %v4048_v31, %v3028_v32 }
 0x1d3   :  { %v3668_v34 = vld [vmem:[%s6395_s5 + $0x5b8] sm:$0xf0]  ;;  %v2285_v56 = vadd.f32 %v2284_v35, %v2271_v52 }
 0x1d4   :  { %2569 = vmatpush.bf16.msrb.mxu2 %v3127_v53  ;;  %2545 = vmatpush.bf16.msrb.mxu0 %v3507_v6  ;;  %v4096_v43 = vld [vmem:[%s6395_s5 + $0x21c] sm:$0xf]  ;;  %v3671_v47 = vor.u32 %v4208_v33, %v3668_v34 }
 0x1d5   :  { %2561 = vmatmul.bf16.vlgmr.msrb.gmra.mxu1 %v5247_v38  ;;  %v3220_v44 = vld [vmem:[%s6395_s5 + $0x238] sm:$0xf0]  ;;  %2633 = vst [vmem:[#allocation2 + $0x48] sm:$0xff] %v2285_v56 }
 0x1d6   :  { %2585 = vmatpush.bf16.msrb.mxu3 %v3319_v0  ;;  %2609 = vmatpush.bf16.msra.mxu1 %v3959_v1  ;;  %v4256_v45 = vld [vmem:[%s6395_s5 + $0x71c] sm:$0xf]  ;;  %v3223_v55 = vor.u32 %v4096_v43, %v3220_v44  ;;  %v2298_v13 = vpop.f32.mrf.mxu2  ;;  %v882_v44 = vperm.slane %v6063_v16, 3 }
 0x1d7   :  { %v3860_v48 = vld [vmem:[%s6395_s5 + $0x738] sm:$0xf0] }
 0x1d8   :  { %2570 = vmatpush.bf16.msrb.mxu2 %v3095_v8  ;;  %2546 = vmatpush.bf16.msrb.mxu0 %v3475_v21  ;;  %v4040_v49 = vld [vmem:[%s6395_s5 + $0x5c] sm:$0xf]  ;;  %v3863_v57 = vor.u32 %v4256_v45, %v3860_v48  ;;  %v2338_v8 = vpop.f32.mrf.mxu1  ;;  %v2324_v14 = vpop.f32.mrf.mxu0 }
 0x1d9   :  { %v2996_v50 = vld [vmem:[%s6395_s5 + $0x78] sm:$0xf0]  ;;  %v2325_v18 = vadd.f32 %v2324_v14, %v2311_v9 }
 0x1da   :  { %2586 = vmatpush.bf16.msrb.mxu3 %v3287_v19  ;;  %2610 = vmatpush.bf16.msra.mxu1 %v3927_v20  ;;  %v4200_v53 = vld [vmem:[%s6395_s5 + $0x55c] sm:$0xf]  ;;  %v2999_v58 = vor.u32 %v4040_v49, %v2996_v50  ;;  %v2299_v20 = vadd.f32 %v2298_v13, %v881_v36 }
 0x1db   :  { %v3636_v54 = vld [vmem:[%s6395_s5 + $0x578] sm:$0xf0]  ;;  %2547 = vmatmul.bf16.vlgmr.msrb.gmra.mxu0 %v5287_v62  ;;  %v2339_v21 = vadd.f32 %v2338_v8, %v2325_v18 }
 0x1dc   :  { %2571 = vmatpush.bf16.msrb.mxu2 %v3063_v26  ;;  %2595 = vmatpush.bf16.msra.mxu0 %v3703_v30  ;;  %v4248_v59 = vld [vmem:[%s6395_s5 + $0x6dc] sm:$0xf]  ;;  %v3639_v61 = vor.u32 %v4200_v53, %v3636_v54  ;;  %v2313_v29 = vadd.f32 %v2312_v27, %v2299_v20 }
 0x1dd   :  { %v3828_v63 = vld [vmem:[%s6395_s5 + $0x6f8] sm:$0xf0]  ;;  %2625 = vst [vmem:[#allocation2 + $0x10] sm:$0xff] %v2339_v21 }
 0x1de   :  { %2587 = vmatpush.bf16.msrb.mxu3 %v3255_v37  ;;  %2611 = vmatpush.bf16.msra.mxu1 %v3895_v40  ;;  %v4032_v0 = vld [vmem:[%s6395_s5 + $0x1c] sm:$0xf]  ;;  %v3831_v6 = vor.u32 %v4248_v59, %v3828_v63 }
 0x1df   :  { %v2964_v1 = vld [vmem:[%s6395_s5 + $0x38] sm:$0xf0] }
 0x1e0   :  { %2572 = vmatpush.bf16.msrb.mxu2 %v3031_v42  ;;  %2596 = vmatpush.bf16.msra.mxu0 %v3671_v47  ;;  %v4192_v3 = vld [vmem:[%s6395_s5 + $0x51c] sm:$0xf]  ;;  %v2967_v7 = vor.u32 %v4032_v0, %v2964_v1  ;;  %v2326_v32 = vpop.f32.mrf.mxu0  ;;  %v2340_v35 = vpop.f32.mrf.mxu1 }
 0x1e1   :  { %v3604_v5 = vld [vmem:[%s6395_s5 + $0x538] sm:$0xf0]  ;;  %v2327_v34 = vadd.f32 %v2326_v32, %v2313_v29  ;;  %v885_v32 = vperm.slane %v6063_v16, 6 }
 0x1e2   :  { %2588 = vmatpush.bf16.msrb.mxu3 %v3223_v55  ;;  %2612 = vmatpush.bf16.msra.mxu1 %v3863_v57  ;;  %v3607_v10 = vor.u32 %v4192_v3, %v3604_v5  ;;  %v4240_v11 = vld [vmem:[%s6395_s5 + $0x69c] sm:$0xf] }
 0x1e3   :  { %v3796_v12 = vld [vmem:[%s6395_s5 + $0x6b8] sm:$0xf0]  ;;  %v2341_v37 = vadd.f32 %v2340_v35, %v2327_v34 }
 0x1e4   :  { %2573 = vmatpush.bf16.msrb.mxu2 %v2999_v58  ;;  %2597 = vmatpush.bf16.msra.mxu0 %v3639_v61  ;;  %v4184_v15 = vld [vmem:[%s6395_s5 + $0x4dc] sm:$0xf]  ;;  %v3799_v19 = vor.u32 %v4240_v11, %v3796_v12 }
 0x1e5   :  { %2589 = vmatmul.bf16.vlgmr.msrb.gmra.mxu3 %v5182_v51  ;;  %v3572_v17 = vld [vmem:[%s6395_s5 + $0x4f8] sm:$0xf0]  ;;  %2634 = vst [vmem:[#allocation2 + $0x50] sm:$0xff] %v2341_v37 }
 0x1e6   :  { %2613 = vmatpush.bf16.msra.mxu1 %v3831_v6  ;;  %v3575_v22 = vor.u32 %v4184_v15, %v3572_v17  ;;  %v4232_v51 = vld [vmem:[%s6395_s5 + $0x65c] sm:$0xf]  ;;  %v884_v15 = vperm.slane %v6063_v16, 5 }
 0x1e7   :  { %v3764_v23 = vld [vmem:[%s6395_s5 + $0x678] sm:$0xf0] }
 0x1e8   :  { %2574 = vmatpush.bf16.msrb.mxu2 %v2967_v7  ;;  %2598 = vmatpush.bf16.msra.mxu0 %v3607_v10  ;;  %v4176_v24 = vld [vmem:[%s6395_s5 + $0x49c] sm:$0xf]  ;;  %v3767_v28 = vor.u32 %v4232_v51, %v3764_v23  ;;  %v2366_v46 = vpop.f32.mrf.mxu3 }
 0x1e9   :  { %v3540_v26 = vld [vmem:[%s6395_s5 + $0x4b8] sm:$0xf0] }
 0x1ea   :  { %2614 = vmatpush.bf16.msra.mxu1 %v3799_v19  ;;  %v3543_v30 = vor.u32 %v4176_v24, %v3540_v26  ;;  %v4224_v25 = vld [vmem:[%s6395_s5 + $0x61c] sm:$0xf] }
 0x1eb   :  { %2575 = vmatmul.bf16.vlgmr.msrb.gmra.mxu2 %v5204_v4  ;;  %v3732_v31 = vld [vmem:[%s6395_s5 + $0x638] sm:$0xf0] }
 0x1ec   :  { %2599 = vmatpush.bf16.msra.mxu0 %v3575_v22  ;;  %v4168_v33 = vld [vmem:[%s6395_s5 + $0x45c] sm:$0xf]  ;;  %v3735_v36 = vor.u32 %v4224_v25, %v3732_v31 }
 0x1ed   :  { %v3508_v4 = vld [vmem:[%s6395_s5 + $0x478] sm:$0xf0] }
 0x1ee   :  { %2615 = vmatpush.bf16.msra.mxu1 %v3767_v28  ;;  %v3511_v39 = vor.u32 %v4168_v33, %v3508_v4  ;;  %v4160_v40 = vld [vmem:[%s6395_s5 + $0x41c] sm:$0xf]  ;;  %v2352_v43 = vpop.f32.mrf.mxu2 }
 0x1ef   :  { %v3476_v41 = vld [vmem:[%s6395_s5 + $0x438] sm:$0xf0]  ;;  %v2353_v45 = vadd.f32 %v2352_v43, %v882_v44  ;;  %s4314_s5 = smov [#allocation2]  }
 0x1f0   :  { %2600 = vmatpush.bf16.msra.mxu0 %v3543_v30  ;;  %v3479_v42 = vor.u32 %v4160_v40, %v3476_v41  ;;  %v2368_v55 = vpop.f32.mrf.mxu3  ;;  %s2644_s21 = sshll.u32 %s4314_s5, 4  ;;  %s2645_s21 = int_to_ptr.vmem [resolvable:$true] %s2644_s21 }
 0x1f1   :  { %v2367_v48 = vadd.f32 %v2366_v46, %v2353_v45 }
 0x1f2   :  { %2616 = vmatpush.bf16.msra.mxu1 %v3735_v36  ;;  %v2394_v47 = vpop.f32.mrf.mxu1 }
 0x1f4   :  { %2601 = vmatpush.bf16.msra.mxu0 %v3511_v39 }
 0x1f5   :  { %2617 = vmatmul.bf16.vlgmr.msra.gmra.mxu1 %v5247_v38 }
 0x1f6   :  { %v2354_v49 = vpop.f32.mrf.mxu2 }
 0x1f7   :  { %v2355_v53 = vadd.f32 %v2354_v49, %v882_v44  ;;  %v886_v49 = vperm.slane %v6063_v16, 7 }
 0x1f8   :  { %2602 = vmatpush.bf16.msra.mxu0 %v3479_v42  ;;  %v2380_v50 = vpop.f32.mrf.mxu0 }
 0x1f9   :  { %v2381_v52 = vadd.f32 %v2380_v50, %v2367_v48  ;;  %v2369_v56 = vadd.f32 %v2368_v55, %v2355_v53 }
 0x1fa   :  { %v2396_v58 = vpop.f32.mrf.mxu1 }
 0x1fb   :  { %2603 = vmatmul.bf16.vlgmr.msra.gmra.mxu0 %v5287_v62  ;;  %v2395_v54 = vadd.f32 %v2394_v47, %v2381_v52  ;;  %v883_v62 = vperm.slane %v6063_v16, 4 }
 0x1fd   :  { %2626 = vst [vmem:[#allocation2 + $0x18] sm:$0xff] %v2395_v54 }
 0x200   :  { %v2382_v57 = vpop.f32.mrf.mxu0 }
 0x201   :  { %v2383_v38 = vadd.f32 %v2382_v57, %v2369_v56 }
 0x203   :  { %v2397_v59 = vadd.f32 %v2396_v58, %v2383_v38 }
 0x205   :  { %2635 = vst [vmem:[#allocation2 + $0x58] sm:$0xff] %v2397_v59 }
 0x208   :  { %v2422_v63 = vpop.f32.mrf.mxu3 }
 0x20e   :  { %v2408_v60 = vpop.f32.mrf.mxu2 }
 0x20f   :  { %v2409_v61 = vadd.f32 %v2408_v60, %v883_v62 }
 0x210   :  { %v2424_v8 = vpop.f32.mrf.mxu3 }
 0x211   :  { %v2423_v1 = vadd.f32 %v2422_v63, %v2409_v61 }
 0x212   :  { %v2450_v0 = vpop.f32.mrf.mxu1 }
 0x216   :  { %v2410_v2 = vpop.f32.mrf.mxu2 }
 0x217   :  { %v2411_v6 = vadd.f32 %v2410_v2, %v883_v62 }
 0x218   :  { %v2436_v3 = vpop.f32.mrf.mxu0 }
 0x219   :  { %v2437_v5 = vadd.f32 %v2436_v3, %v2423_v1  ;;  %v2425_v9 = vadd.f32 %v2424_v8, %v2411_v6 }
 0x21a   :  { %v2452_v12 = vpop.f32.mrf.mxu1 }
 0x21b   :  { %v2451_v7 = vadd.f32 %v2450_v0, %v2437_v5 }
 0x21d   :  { %2627 = vst [vmem:[#allocation2 + $0x20] sm:$0xff] %v2451_v7 }
 0x220   :  { %v2438_v10 = vpop.f32.mrf.mxu0 }
 0x221   :  { %v2439_v11 = vadd.f32 %v2438_v10, %v2425_v9 }
 0x223   :  { %v2453_v13 = vadd.f32 %v2452_v12, %v2439_v11 }
 0x225   :  { %2636 = vst [vmem:[#allocation2 + $0x60] sm:$0xff] %v2453_v13 }
 0x228   :  { %v2478_v18 = vpop.f32.mrf.mxu3 }
 0x22e   :  { %v2464_v14 = vpop.f32.mrf.mxu2 }
 0x22f   :  { %v2465_v17 = vadd.f32 %v2464_v14, %v884_v15 }
 0x230   :  { %v2480_v26 = vpop.f32.mrf.mxu3 }
 0x231   :  { %v2479_v20 = vadd.f32 %v2478_v18, %v2465_v17 }
 0x232   :  { %v2506_v19 = vpop.f32.mrf.mxu1 }
 0x236   :  { %v2466_v21 = vpop.f32.mrf.mxu2 }
 0x237   :  { %v2467_v23 = vadd.f32 %v2466_v21, %v884_v15 }
 0x238   :  { %v2492_v22 = vpop.f32.mrf.mxu0 }
 0x239   :  { %v2493_v51 = vadd.f32 %v2492_v22, %v2479_v20  ;;  %v2481_v27 = vadd.f32 %v2480_v26, %v2467_v23 }
 0x23a   :  { %v2508_v30 = vpop.f32.mrf.mxu1 }
 0x23b   :  { %v2507_v24 = vadd.f32 %v2506_v19, %v2493_v51 }
 0x23d   :  { %2628 = vst [vmem:[#allocation2 + $0x28] sm:$0xff] %v2507_v24 }
 0x240   :  { %v2494_v28 = vpop.f32.mrf.mxu0 }
 0x241   :  { %v2495_v29 = vadd.f32 %v2494_v28, %v2481_v27 }
 0x243   :  { %v2509_v25 = vadd.f32 %v2508_v30, %v2495_v29 }
 0x245   :  { %2637 = vst [vmem:[#allocation2 + $0x68] sm:$0xff] %v2509_v25 }
 0x248   :  { %v2534_v4 = vpop.f32.mrf.mxu3 }
 0x24e   :  { %v2520_v31 = vpop.f32.mrf.mxu2 }
 0x24f   :  { %v2521_v33 = vadd.f32 %v2520_v31, %v885_v32 }
 0x250   :  { %v2536_v42 = vpop.f32.mrf.mxu3 }
 0x251   :  { %v2535_v35 = vadd.f32 %v2534_v4, %v2521_v33 }
 0x252   :  { %v2562_v34 = vpop.f32.mrf.mxu1 }
 0x256   :  { %v2522_v36 = vpop.f32.mrf.mxu2 }
 0x257   :  { %v2523_v40 = vadd.f32 %v2522_v36, %v885_v32 }
 0x258   :  { %v2548_v37 = vpop.f32.mrf.mxu0 }
 0x259   :  { %v2549_v39 = vadd.f32 %v2548_v37, %v2535_v35  ;;  %v2537_v43 = vadd.f32 %v2536_v42, %v2523_v40 }
 0x25a   :  { %v2564_v46 = vpop.f32.mrf.mxu1 }
 0x25b   :  { %v2563_v41 = vadd.f32 %v2562_v34, %v2549_v39 }
 0x25d   :  { %2629 = vst [vmem:[#allocation2 + $0x30] sm:$0xff] %v2563_v41 }
 0x260   :  { %v2550_v44 = vpop.f32.mrf.mxu0 }
 0x261   :  { %v2551_v45 = vadd.f32 %v2550_v44, %v2537_v43 }
 0x263   :  { %v2565_v47 = vadd.f32 %v2564_v46, %v2551_v45 }
 0x265   :  { %2638 = vst [vmem:[#allocation2 + $0x70] sm:$0xff] %v2565_v47 }
 0x268   :  { %v2590_v52 = vpop.f32.mrf.mxu3 }
 0x26e   :  { %v2576_v48 = vpop.f32.mrf.mxu2 }
 0x26f   :  { %v2577_v50 = vadd.f32 %v2576_v48, %v886_v49 }
 0x270   :  { %v2592_v59 = vpop.f32.mrf.mxu3 }
 0x271   :  { %v2591_v54 = vadd.f32 %v2590_v52, %v2577_v50 }
 0x272   :  { %v2618_v53 = vpop.f32.mrf.mxu1 }
 0x276   :  { %v2578_v55 = vpop.f32.mrf.mxu2 }
 0x277   :  { %v2579_v38 = vadd.f32 %v2578_v55, %v886_v49 }
 0x278   :  { %v2604_v56 = vpop.f32.mrf.mxu0 }
 0x279   :  { %v2605_v57 = vadd.f32 %v2604_v56, %v2591_v54  ;;  %v2593_v60 = vadd.f32 %v2592_v59, %v2579_v38 }
 0x27a   :  { %v2620_v61 = vpop.f32.mrf.mxu1 }
 0x27b   :  { %v2619_v58 = vadd.f32 %v2618_v53, %v2605_v57 }
 0x27d   :  { %2631 = vst.msk [vmem:[#allocation2 + $0x38] sm:$0xff] %vm2630_vm1, %v2619_v58 }
 0x280   :  { %v2606_v16 = vpop.f32.mrf.mxu0 }
 0x281   :  { %v2607_v62 = vadd.f32 %v2606_v16, %v2593_v60 }
 0x283   :  { %v2621_v63 = vadd.f32 %v2620_v61, %v2607_v62 }
 0x285   :  { %2639 = vst.msk [vmem:[#allocation2 + $0x78] sm:$0xff] %vm2630_vm1, %v2621_v63 }
 0x286   :  { %2652 = dma.vmem_to_hbm [thread:$0]  %s2645_s21, 2048, %s2647_s24, [#allocation3], %s4315_s1, %s4315_s1, %s4316_s25  }
 0x287   :  { %4312 = dma.done.wait [#allocation3], 2048  }
 0x288   :  { %4313 = vsyncadd [#allocation3], 4294965248 }
 0x289   :  { %2657 = vsyncpa [#allocation3], 1 }

</bundles_post_ra>
